<compile_context>
chip_gen: v6e
topology: v6e:2x2x1
jax: 0.10.0
libtpu: 0.0.40
codegen_flags: <defaults>
</compile_context>

<pallas_src>
import numpy as np
import jax
import jax.numpy as jnp
from jax.experimental import pallas as pl
from jax.experimental.pallas import tpu as pltpu

K = 3          # kernel_size
STRIDE = 2
PADDING = 1
OUT_PAD = 1    # output_padding
EPS = 1e-5
SLOPE = 0.01   # LeakyReLU negative_slope
NUM_LAYERS = 3
CHANNELS = (4, 16, 32, 1)


def _rup(x, m):
    return ((x + m - 1) // m) * m


# ---------------------------------------------------------------------------
# Packed-parameter layout: everything the kernel needs lives in ONE lane-dense
# (rows, 128) f32 buffer (single DMA).  Each block starts at an 8-aligned row.
# ---------------------------------------------------------------------------
def plan_layout(n, l0):
    layers = []
    off = 0
    max_cols = 16
    l = l0
    for i in range(NUM_LAYERS):
        c_in, c_out = CHANNELS[i], CHANNELS[i + 1]
        m = n * l                                   # flattened input length (lanes)
        ent = dict(c_in=c_in, c_out=c_out, m=m, l_in=l)
        ent["wt"] = off; off += _rup(3 * c_out, 8)  # fused convT weights [W1T;W2T;W0T]
        if c_out > 1:
            ent["w1"] = off; off += _rup(c_out, 8)  # res conv1, taps fused along cols
            ent["w2"] = off; off += _rup(c_out, 8)  # res conv2
            ent["vec"] = off; off += _rup(c_out, 8) # [gamma, beta, b1, b2] per channel
            max_cols = max(max_cols, 3 * c_out)
        else:
            ent["scal"] = off; off += 8             # all 1-channel scalars in one row
        ent["E"] = off; off += _rup(m, 8)           # even-interleave 0/1 matrix (m, 2m)
        ent["O"] = off; off += _rup(m, 8)           # odd-interleave  0/1 matrix (m, 2m)
        max_cols = max(max_cols, c_in, 2 * m)
        layers.append(ent)
        l *= 2
    final = off; off += 8                           # final Conv1d(1,1,3) taps + bias
    return dict(layers=layers, final=final, rows=_rup(off, 8), cols=_rup(max_cols, 128))


def pack_params(params, layout):
    buf = np.zeros((layout["rows"], layout["cols"]), np.float32)
    for p, ent in zip(params["layers"], layout["layers"]):
        c_in, c_out, m = ent["c_in"], ent["c_out"], ent["m"]
        wt = np.asarray(p["wt"], np.float32)                 # torch (c_in, c_out, K)
        # Fused ConvTranspose front-end rows: [W[:,:,1].T ; W[:,:,2].T ; W[:,:,0].T].
        # (ConvT bias intentionally NOT packed: dead under training-mode BatchNorm.)
        buf[ent["wt"]:ent["wt"] + 3 * c_out, :c_in] = np.concatenate(
            [wt[:, :, 1].T, wt[:, :, 2].T, wt[:, :, 0].T], axis=0)
        if c_out > 1:
            w1 = np.asarray(p["w1"], np.float32)             # torch (c_out, c_out, K)
            w2 = np.asarray(p["w2"], np.float32)
            buf[ent["w1"]:ent["w1"] + c_out, :3 * c_out] = np.concatenate(
                [w1[:, :, 0], w1[:, :, 1], w1[:, :, 2]], axis=1)
            buf[ent["w2"]:ent["w2"] + c_out, :3 * c_out] = np.concatenate(
                [w2[:, :, 0], w2[:, :, 1], w2[:, :, 2]], axis=1)
            buf[ent["vec"]:ent["vec"] + c_out, 0] = np.asarray(p["gamma"], np.float32)
            buf[ent["vec"]:ent["vec"] + c_out, 1] = np.asarray(p["beta"], np.float32)
            buf[ent["vec"]:ent["vec"] + c_out, 2] = np.asarray(p["b1"], np.float32)
            buf[ent["vec"]:ent["vec"] + c_out, 3] = np.asarray(p["b2"], np.float32)
        else:
            r = ent["scal"]
            buf[r, 0] = float(np.asarray(p["gamma"])[0])
            buf[r, 1] = float(np.asarray(p["beta"])[0])
            buf[r, 2:5] = np.asarray(p["w1"], np.float32).reshape(3)
            buf[r, 5] = float(np.asarray(p["b1"])[0])
            buf[r, 6:9] = np.asarray(p["w2"], np.float32).reshape(3)
            buf[r, 9] = float(np.asarray(p["b2"])[0])
        # 0/1 interleave matrices: y[:, 2p] = even[:, p], y[:, 2p+1] = odd[:, p]
        idx = np.arange(m)
        buf[ent["E"] + idx, 2 * idx] = 1.0
        buf[ent["O"] + idx, 2 * idx + 1] = 1.0
    buf[layout["final"], 0:3] = np.asarray(params["final"]["w"], np.float32).reshape(3)
    buf[layout["final"], 3] = float(np.asarray(params["final"]["b"])[0])
    return jnp.asarray(buf)


# ---------------------------------------------------------------------------
# Fused decoder kernel (single invocation, everything resident in VMEM)
# ---------------------------------------------------------------------------
def make_decoder_kernel(n_batch, l0, layout):
    layers = layout["layers"]

    def _edge_masks(nl, l):
        """(1, nl) f32 masks: zero the first / last column of each length-l batch block."""
        pos = jax.lax.broadcasted_iota(jnp.int32, (1, nl), 1) % l
        first = jnp.where(pos == 0, 0.0, 1.0)
        last = jnp.where(pos == l - 1, 0.0, 1.0)
        return first, last

    def kernel(x_ref, prm_ref, out_ref):
        h = x_ref[...]                                          # (C0, n*l0) lane-dense
        for ent in layers:
            c_in, c_out = ent["c_in"], ent["c_out"]
            l_in, m = ent["l_in"], ent["m"]
            l_out, nl_out = 2 * l_in, 2 * m

            # ---- ConvTranspose1d(k=3, s=2, p=1, op=1): phase decomposition ----
            # single fused MXU dot for all three taps
            wt = prm_ref[ent["wt"]:ent["wt"] + 3 * c_out, 0:c_in]
            t = jnp.dot(wt, h, preferred_element_type=jnp.float32)    # (3*c_out, m)
            even = t[0:c_out, :]                                 # tap k=1 -> even outputs
            t2 = t[c_out:2 * c_out, :]                           # tap k=2 -> odd outputs
            t0 = t[2 * c_out:3 * c_out, :]                       # tap k=0 -> odd (from p+1)
            _, last_in = _edge_masks(m, l_in)
            odd = t2 + last_in * pltpu.roll(t0, m - 1, axis=1)   # t0[:, p+1], 0 at block end
            # interleave even/odd -> (c_out, 2m) with precomputed 0/1 matrices (MXU)
            em = prm_ref[ent["E"]:ent["E"] + m, 0:nl_out]
            om = prm_ref[ent["O"]:ent["O"] + m, 0:nl_out]
            y = (jnp.dot(even, em, preferred_element_type=jnp.float32) +
                 jnp.dot(odd, om, preferred_element_type=jnp.float32))

            if c_out > 1:
                v = ent["vec"]
                gamma = prm_ref[v:v + c_out, 0:1]
                beta = prm_ref[v:v + c_out, 1:2]
                b1 = prm_ref[v:v + c_out, 2:3]
                b2 = prm_ref[v:v + c_out, 3:4]
            else:
                s = ent["scal"]
                sc = lambda j: prm_ref[s:s + 1, j:j + 1]         # (1, 1) scalar slices
                gamma, beta = sc(0), sc(1)

            # ---- BatchNorm1d (training batch stats, single pass) + LeakyReLU ----
            inv_n = 1.0 / nl_out
            mean = jnp.sum(y, axis=1, keepdims=True) * inv_n
            ex2 = jnp.sum(y * y, axis=1, keepdims=True) * inv_n
            var = ex2 - mean * mean
            scale = gamma * jax.lax.rsqrt(var + EPS)
            shift = beta - mean * scale
            y = y * scale + shift
            y = jnp.where(y > 0, y, SLOPE * y)

            # ---- res_1d: conv3 -> ReLU -> conv3 ; add ; ReLU (+ folded LeakyReLU) ----
            first, last = _edge_masks(nl_out, l_out)
            if c_out > 1:
                w1 = prm_ref[ent["w1"]:ent["w1"] + c_out, 0:3 * c_out]
                w2 = prm_ref[ent["w2"]:ent["w2"] + c_out, 0:3 * c_out]

                def conv3(z, w, b):
                    z_sr = first * pltpu.roll(z, 1, axis=1)            # z[:, j-1]
                    z_sl = last * pltpu.roll(z, nl_out - 1, axis=1)    # z[:, j+1]
                    zc = jnp.concatenate([z_sr, z, z_sl], axis=0)      # (3*c_out, nl_out)
                    return jnp.dot(w, zc, preferred_element_type=jnp.float32) + b

                r = jnp.maximum(conv3(y, w1, b1), 0.0)
                r = conv3(r, w2, b2)
            else:
                def fir3(z, k0, k1, k2, b):
                    z_sr = first * pltpu.roll(z, 1, axis=1)
                    z_sl = last * pltpu.roll(z, nl_out - 1, axis=1)
                    return k0 * z_sr + k1 * z + k2 * z_sl + b

                r = jnp.maximum(fir3(y, sc(2), sc(3), sc(4), sc(5)), 0.0)
                r = fir3(r, sc(6), sc(7), sc(8), sc(9))
            h = jnp.maximum(y + r, 0.0)

        # ---- final Conv1d(1, 1, 3, padding=1) as a 3-tap VPU FIR ----
        l_fin = l0 * (2 ** NUM_LAYERS)
        nl_fin = n_batch * l_fin
        first, last = _edge_masks(nl_fin, l_fin)
        f = layout["final"]
        fc = lambda j: prm_ref[f:f + 1, j:j + 1]
        h_sr = first * pltpu.roll(h, 1, axis=1)
        h_sl = last * pltpu.roll(h, nl_fin - 1, axis=1)
        out_ref[...] = fc(0) * h_sr + fc(1) * h + fc(2) * h_sl + fc(3)

    return kernel


# ---------------------------------------------------------------------------
# Wrapper: one fused pallas_call, whole-array VMEM refs, no grid
# ---------------------------------------------------------------------------
def make_decoder_fn(n, c0, l0, layout):
    l_out = l0 * (2 ** NUM_LAYERS)
    call = pl.pallas_call(
        make_decoder_kernel(n, l0, layout),
        out_shape=jax.ShapeDtypeStruct((1, n * l_out), jnp.float32),
    )

    @jax.jit
    def fwd(x, packed):
        # NCL -> lane-dense (C, N*L), batch-major lanes
        x2d = jnp.transpose(x.astype(jnp.float32), (1, 0, 2)).reshape(c0, n * l0)
        out2d = call(x2d, packed)
        # lane-dense (1, N*L) -> NCL (N, 1, L)
        return jnp.transpose(out2d.reshape(1, n, l_out), (1, 0, 2))

    return fwd


# ---------------------------------------------------------------------------
# Deterministic parameter init (torch-native layouts, per the module __init__)
# ---------------------------------------------------------------------------
def init_params(key):
    params = {"layers": []}
    for i in range(NUM_LAYERS):
        c_in, c_out = CHANNELS[i], CHANNELS[i + 1]
        key, *ks = jax.random.split(key, 7)
        params["layers"].append(dict(
            wt=0.2 * jax.random.normal(ks[0], (c_in, c_out, K), jnp.float32),   # ConvT weight
            bt=0.1 * jax.random.normal(ks[1], (c_out,), jnp.float32),           # ConvT bias
            gamma=jnp.ones((c_out,), jnp.float32),                              # BN affine
            beta=jnp.zeros((c_out,), jnp.float32),
            w1=0.2 * jax.random.normal(ks[2], (c_out, c_out, K), jnp.float32),  # res conv1
            b1=0.1 * jax.random.normal(ks[3], (c_out,), jnp.float32),
            w2=0.2 * jax.random.normal(ks[4], (c_out, c_out, K), jnp.float32),  # res conv2
            b2=0.1 * jax.random.normal(ks[5], (c_out,), jnp.float32),
        ))
    key, k1, k2 = jax.random.split(key, 3)
    params["final"] = dict(w=0.2 * jax.random.normal(k1, (1, 1, K), jnp.float32),
                           b=0.1 * jax.random.normal(k2, (1,), jnp.float32))
    return params


# ---------------------------------------------------------------------------
# Pure-JAX reference (mirrors PyTorch semantics, incl. ConvT bias) for checking
# ---------------------------------------------------------------------------
def _convT_ref(x, w, b):
    """ConvTranspose1d(k=3, s=2, p=1, op=1) via zero-stuffing.  w: (c_in, c_out, K)."""
    n, c_in, l_in = x.shape
    l_out = (l_in - 1) * STRIDE - 2 * PADDING + K + OUT_PAD
    xs = jnp.zeros((n, c_in, (l_in - 1) * STRIDE + 1), x.dtype).at[:, :, ::STRIDE].set(x)
    xp = jnp.pad(xs, ((0, 0), (0, 0), (K - 1 - PADDING, K - 1 - PADDING + OUT_PAD)))
    y = sum(jnp.einsum('io,nil->nol', w[:, :, K - 1 - k], xp[:, :, k:k + l_out])
            for k in range(K))
    return y + b.reshape(1, -1, 1)


def _conv3_ref(x, w, b):
    """Conv1d(k=3, padding=1).  w: (c_out, c_in, K)."""
    n, c, l = x.shape
    xp = jnp.pad(x, ((0, 0), (0, 0), (1, 1)))
    y = sum(jnp.einsum('oc,ncl->nol', w[:, :, k], xp[:, :, k:k + l]) for k in range(K))
    return y + b.reshape(1, -1, 1)


def decoder_forward_ref(x, params):
    h = x.astype(jnp.float32)
    for p in params["layers"]:
        y = _convT_ref(h, p["wt"], p["bt"])
        mean = jnp.mean(y, axis=(0, 2), keepdims=True)
        var = jnp.mean((y - mean) ** 2, axis=(0, 2), keepdims=True)
        y = (y - mean) * jax.lax.rsqrt(var + EPS)
        y = y * p["gamma"].reshape(1, -1, 1) + p["beta"].reshape(1, -1, 1)
        y = jnp.where(y > 0, y, SLOPE * y)                        # LeakyReLU
        r = jnp.maximum(_conv3_ref(y, p["w1"], p["b1"]), 0.0)     # res1_3: conv -> ReLU
        r = _conv3_ref(r, p["w2"], p["b2"])                       # res1_3: conv
        y = jnp.maximum(y + r, 0.0)                               # res_relu5
        h = jnp.where(y > 0, y, SLOPE * y)                        # trailing LeakyReLU
    return _conv3_ref(h, params["final"]["w"], params["final"]["b"])


if __name__ == "__main__":
    key = jax.random.PRNGKey(0)
    key, pkey, xkey = jax.random.split(key, 3)
    params = init_params(pkey)

    # input: (batch=2, channels=4 == channels[0], length=8)  ->  output (2, 1, 64)
    N, C0, L0 = 2, CHANNELS[0], 8
    x = jax.random.normal(xkey, (N, C0, L0), jnp.float32)

    layout = plan_layout(N, L0)
    packed = pack_params(params, layout)          # single lane-dense parameter buffer
    decoder_forward = make_decoder_fn(N, C0, L0, layout)

    out = jax.block_until_ready(decoder_forward(x, packed))
    ref = jax.block_until_ready(decoder_forward_ref(x, params))

    assert out.shape == (N, 1, L0 * 2 ** NUM_LAYERS), out.shape
    np.testing.assert_allclose(np.asarray(out), np.asarray(ref), rtol=2e-3, atol=2e-3)
    print("KERNEL_OK")
</pallas_src>

<mosaic_0001>
module attributes {stable_mosaic.version = 11 : i64} {
  func.func @kernel(%arg0: memref<4x16xf32, #tpu.memory_space<vmem>>, %arg1: memref<536x128xf32, #tpu.memory_space<vmem>>, %arg2: memref<1x128xf32, #tpu.memory_space<vmem>>) attributes {dimension_semantics = [], scalar_prefetch = 0 : i64, scratch_operands = 0 : i64, tpu.core_type = #tpu.core_type<tc>} {
    %c0 = arith.constant 0 : index
    %c0_0 = arith.constant 0 : index
    %0 = vector.load %arg0[%c0, %c0_0] : memref<4x16xf32, #tpu.memory_space<vmem>>, vector<4x16xf32>
    %c0_1 = arith.constant 0 : index
    %c0_2 = arith.constant 0 : index
    %1 = vector.load %arg1[%c0_1, %c0_2] : memref<536x128xf32, #tpu.memory_space<vmem>>, vector<48x4xf32>
    %cst = arith.constant dense<0.000000e+00> : vector<48x16xf32>
    %2 = tpu.matmul %1, %0, %cst {dimension_numbers = #tpu.dot_dimension_numbers<[1], [0], [0], [1], [0, 0, 1, 1], [], []>} : vector<48x4xf32>, vector<4x16xf32>, vector<48x16xf32> -> vector<48x16xf32>
    %3 = vector.extract_strided_slice %2 {offsets = [0, 0], sizes = [16, 16], strides = [1, 1]} : vector<48x16xf32> to vector<16x16xf32>
    %4 = vector.extract_strided_slice %2 {offsets = [16, 0], sizes = [16, 16], strides = [1, 1]} : vector<48x16xf32> to vector<16x16xf32>
    %5 = vector.extract_strided_slice %2 {offsets = [32, 0], sizes = [16, 16], strides = [1, 1]} : vector<48x16xf32> to vector<16x16xf32>
    %6 = tpu.iota {dimensions = array<i32: 1>} : vector<1x16xi32>
    %c8_i32 = arith.constant 8 : i32
    %c0_i32 = arith.constant 0 : i32
    %7 = arith.cmpi eq, %c8_i32, %c0_i32 : i32
    %c1_i32 = arith.constant 1 : i32
    %8 = arith.select %7, %c1_i32, %c8_i32 : i32
    %9 = vector.broadcast %8 : i32 to vector<1x16xi32>
    %10 = arith.remsi %6, %9 : vector<1x16xi32>
    %c0_i32_3 = arith.constant 0 : i32
    %11 = vector.broadcast %c0_i32_3 : i32 to vector<1x16xi32>
    %12 = arith.cmpi ne, %10, %11 : vector<1x16xi32>
    %c0_i32_4 = arith.constant 0 : i32
    %13 = vector.broadcast %c0_i32_4 : i32 to vector<1x16xi32>
    %14 = arith.cmpi slt, %10, %13 : vector<1x16xi32>
    %c0_i32_5 = arith.constant 0 : i32
    %15 = arith.cmpi slt, %8, %c0_i32_5 : i32
    %16 = vector.broadcast %15 : i1 to vector<1x16xi1>
    %17 = vector.broadcast %16 : vector<1x16xi1> to vector<1x16xi1>
    %18 = arith.xori %14, %17 : vector<1x16xi1>
    %19 = arith.andi %18, %12 : vector<1x16xi1>
    %20 = vector.broadcast %8 : i32 to vector<1x16xi32>
    %21 = arith.addi %10, %20 : vector<1x16xi32>
    %22 = arith.select %19, %21, %10 : vector<1x16xi1>, vector<1x16xi32>
    %c7_i32 = arith.constant 7 : i32
    %23 = vector.broadcast %c7_i32 : i32 to vector<1x16xi32>
    %24 = arith.cmpi eq, %22, %23 : vector<1x16xi32>
    %cst_6 = arith.constant 0.000000e+00 : f32
    %cst_7 = arith.constant 1.000000e+00 : f32
    %25 = vector.broadcast %cst_6 : f32 to vector<1x16xf32>
    %26 = vector.broadcast %cst_7 : f32 to vector<1x16xf32>
    %27 = arith.select %24, %25, %26 : vector<1x16xi1>, vector<1x16xf32>
    %c15_i32 = arith.constant 15 : i32
    %28 = tpu.dynamic_rotate %5 by %c15_i32 dim 1 : vector<16x16xf32>, i32 -> vector<16x16xf32>
    %29 = vector.broadcast %27 : vector<1x16xf32> to vector<16x16xf32>
    %30 = arith.mulf %29, %28 : vector<16x16xf32>
    %31 = arith.addf %4, %30 : vector<16x16xf32>
    %c96 = arith.constant 96 : index
    %c0_8 = arith.constant 0 : index
    %32 = vector.load %arg1[%c96, %c0_8] : memref<536x128xf32, #tpu.memory_space<vmem>>, vector<16x32xf32>
    %c112 = arith.constant 112 : index
    %c0_9 = arith.constant 0 : index
    %33 = vector.load %arg1[%c112, %c0_9] : memref<536x128xf32, #tpu.memory_space<vmem>>, vector<16x32xf32>
    %cst_10 = arith.constant dense<0.000000e+00> : vector<16x32xf32>
    %34 = tpu.matmul %3, %32, %cst_10 {dimension_numbers = #tpu.dot_dimension_numbers<[1], [0], [0], [1], [0, 0, 1, 1], [], []>} : vector<16x16xf32>, vector<16x32xf32>, vector<16x32xf32> -> vector<16x32xf32>
    %cst_11 = arith.constant dense<0.000000e+00> : vector<16x32xf32>
    %35 = tpu.matmul %31, %33, %cst_11 {dimension_numbers = #tpu.dot_dimension_numbers<[1], [0], [0], [1], [0, 0, 1, 1], [], []>} : vector<16x16xf32>, vector<16x32xf32>, vector<16x32xf32> -> vector<16x32xf32>
    %36 = arith.addf %34, %35 : vector<16x32xf32>
    %c80 = arith.constant 80 : index
    %c0_12 = arith.constant 0 : index
    %37 = vector.load %arg1[%c80, %c0_12] : memref<536x128xf32, #tpu.memory_space<vmem>>, vector<16x1xf32>
    %c80_13 = arith.constant 80 : index
    %c1 = arith.constant 1 : index
    %38 = vector.load %arg1[%c80_13, %c1] : memref<536x128xf32, #tpu.memory_space<vmem>>, vector<16x1xf32>
    %c80_14 = arith.constant 80 : index
    %c2 = arith.constant 2 : index
    %39 = vector.load %arg1[%c80_14, %c2] : memref<536x128xf32, #tpu.memory_space<vmem>>, vector<16x1xf32>
    %c80_15 = arith.constant 80 : index
    %c3 = arith.constant 3 : index
    %40 = vector.load %arg1[%c80_15, %c3] : memref<536x128xf32, #tpu.memory_space<vmem>>, vector<16x1xf32>
    %cst_16 = arith.constant dense<0.000000e+00> : vector<16xf32>
    %41 = vector.multi_reduction <add>, %36, %cst_16 [1] : vector<16x32xf32> to vector<16xf32>
    %42 = vector.shape_cast %41 : vector<16xf32> to vector<16x1xf32>
    %cst_17 = arith.constant 3.125000e-02 : f32
    %43 = vector.broadcast %cst_17 : f32 to vector<16x1xf32>
    %44 = arith.mulf %42, %43 : vector<16x1xf32>
    %45 = arith.mulf %36, %36 : vector<16x32xf32>
    %cst_18 = arith.constant dense<0.000000e+00> : vector<16xf32>
    %46 = vector.multi_reduction <add>, %45, %cst_18 [1] : vector<16x32xf32> to vector<16xf32>
    %47 = vector.shape_cast %46 : vector<16xf32> to vector<16x1xf32>
    %cst_19 = arith.constant 3.125000e-02 : f32
    %48 = vector.broadcast %cst_19 : f32 to vector<16x1xf32>
    %49 = arith.mulf %47, %48 : vector<16x1xf32>
    %50 = arith.mulf %44, %44 : vector<16x1xf32>
    %51 = arith.subf %49, %50 : vector<16x1xf32>
    %cst_20 = arith.constant 9.99999974E-6 : f32
    %52 = vector.broadcast %cst_20 : f32 to vector<16x1xf32>
    %53 = arith.addf %51, %52 : vector<16x1xf32>
    %54 = math.rsqrt %53 : vector<16x1xf32>
    %55 = arith.mulf %37, %54 : vector<16x1xf32>
    %56 = arith.mulf %44, %55 : vector<16x1xf32>
    %57 = arith.subf %38, %56 : vector<16x1xf32>
    %58 = vector.broadcast %55 : vector<16x1xf32> to vector<16x32xf32>
    %59 = arith.mulf %36, %58 : vector<16x32xf32>
    %60 = vector.broadcast %57 : vector<16x1xf32> to vector<16x32xf32>
    %61 = arith.addf %59, %60 : vector<16x32xf32>
    %cst_21 = arith.constant 0.000000e+00 : f32
    %62 = vector.broadcast %cst_21 : f32 to vector<16x32xf32>
    %63 = arith.cmpf ogt, %61, %62 : vector<16x32xf32>
    %cst_22 = arith.constant 0.00999999977 : f32
    %64 = vector.broadcast %cst_22 : f32 to vector<16x32xf32>
    %65 = arith.mulf %64, %61 : vector<16x32xf32>
    %66 = arith.select %63, %61, %65 : vector<16x32xi1>, vector<16x32xf32>
    %67 = tpu.iota {dimensions = array<i32: 1>} : vector<1x32xi32>
    %c16_i32 = arith.constant 16 : i32
    %c0_i32_23 = arith.constant 0 : i32
    %68 = arith.cmpi eq, %c16_i32, %c0_i32_23 : i32
    %c1_i32_24 = arith.constant 1 : i32
    %69 = arith.select %68, %c1_i32_24, %c16_i32 : i32
    %70 = vector.broadcast %69 : i32 to vector<1x32xi32>
    %71 = arith.remsi %67, %70 : vector<1x32xi32>
    %c0_i32_25 = arith.constant 0 : i32
    %72 = vector.broadcast %c0_i32_25 : i32 to vector<1x32xi32>
    %73 = arith.cmpi ne, %71, %72 : vector<1x32xi32>
    %c0_i32_26 = arith.constant 0 : i32
    %74 = vector.broadcast %c0_i32_26 : i32 to vector<1x32xi32>
    %75 = arith.cmpi slt, %71, %74 : vector<1x32xi32>
    %c0_i32_27 = arith.constant 0 : i32
    %76 = arith.cmpi slt, %69, %c0_i32_27 : i32
    %77 = vector.broadcast %76 : i1 to vector<1x32xi1>
    %78 = vector.broadcast %77 : vector<1x32xi1> to vector<1x32xi1>
    %79 = arith.xori %75, %78 : vector<1x32xi1>
    %80 = arith.andi %79, %73 : vector<1x32xi1>
    %81 = vector.broadcast %69 : i32 to vector<1x32xi32>
    %82 = arith.addi %71, %81 : vector<1x32xi32>
    %83 = arith.select %80, %82, %71 : vector<1x32xi1>, vector<1x32xi32>
    %c0_i32_28 = arith.constant 0 : i32
    %84 = vector.broadcast %c0_i32_28 : i32 to vector<1x32xi32>
    %85 = arith.cmpi eq, %83, %84 : vector<1x32xi32>
    %cst_29 = arith.constant 0.000000e+00 : f32
    %cst_30 = arith.constant 1.000000e+00 : f32
    %86 = vector.broadcast %cst_29 : f32 to vector<1x32xf32>
    %87 = vector.broadcast %cst_30 : f32 to vector<1x32xf32>
    %88 = arith.select %85, %86, %87 : vector<1x32xi1>, vector<1x32xf32>
    %c15_i32_31 = arith.constant 15 : i32
    %89 = vector.broadcast %c15_i32_31 : i32 to vector<1x32xi32>
    %90 = arith.cmpi eq, %83, %89 : vector<1x32xi32>
    %cst_32 = arith.constant 0.000000e+00 : f32
    %cst_33 = arith.constant 1.000000e+00 : f32
    %91 = vector.broadcast %cst_32 : f32 to vector<1x32xf32>
    %92 = vector.broadcast %cst_33 : f32 to vector<1x32xf32>
    %93 = arith.select %90, %91, %92 : vector<1x32xi1>, vector<1x32xf32>
    %c48 = arith.constant 48 : index
    %c0_34 = arith.constant 0 : index
    %94 = vector.load %arg1[%c48, %c0_34] : memref<536x128xf32, #tpu.memory_space<vmem>>, vector<16x48xf32>
    %c64 = arith.constant 64 : index
    %c0_35 = arith.constant 0 : index
    %95 = vector.load %arg1[%c64, %c0_35] : memref<536x128xf32, #tpu.memory_space<vmem>>, vector<16x48xf32>
    %c1_i32_36 = arith.constant 1 : i32
    %96 = tpu.dynamic_rotate %66 by %c1_i32_36 dim 1 : vector<16x32xf32>, i32 -> vector<16x32xf32>
    %97 = vector.broadcast %88 : vector<1x32xf32> to vector<16x32xf32>
    %98 = arith.mulf %97, %96 : vector<16x32xf32>
    %c31_i32 = arith.constant 31 : i32
    %99 = tpu.dynamic_rotate %66 by %c31_i32 dim 1 : vector<16x32xf32>, i32 -> vector<16x32xf32>
    %100 = vector.broadcast %93 : vector<1x32xf32> to vector<16x32xf32>
    %101 = arith.mulf %100, %99 : vector<16x32xf32>
    %102 = tpu.concatenate %98, %66, %101 in 0 : vector<16x32xf32>, vector<16x32xf32>, vector<16x32xf32> -> vector<48x32xf32>
    %cst_37 = arith.constant dense<0.000000e+00> : vector<16x32xf32>
    %103 = tpu.matmul %94, %102, %cst_37 {dimension_numbers = #tpu.dot_dimension_numbers<[1], [0], [0], [1], [0, 0, 1, 1], [], []>} : vector<16x48xf32>, vector<48x32xf32>, vector<16x32xf32> -> vector<16x32xf32>
    %104 = vector.broadcast %39 : vector<16x1xf32> to vector<16x32xf32>
    %105 = arith.addf %103, %104 : vector<16x32xf32>
    %cst_38 = arith.constant 0.000000e+00 : f32
    %106 = vector.broadcast %cst_38 : f32 to vector<16x32xf32>
    %107 = arith.maximumf %105, %106 : vector<16x32xf32>
    %c1_i32_39 = arith.constant 1 : i32
    %108 = tpu.dynamic_rotate %107 by %c1_i32_39 dim 1 : vector<16x32xf32>, i32 -> vector<16x32xf32>
    %109 = vector.broadcast %88 : vector<1x32xf32> to vector<16x32xf32>
    %110 = arith.mulf %109, %108 : vector<16x32xf32>
    %c31_i32_40 = arith.constant 31 : i32
    %111 = tpu.dynamic_rotate %107 by %c31_i32_40 dim 1 : vector<16x32xf32>, i32 -> vector<16x32xf32>
    %112 = vector.broadcast %93 : vector<1x32xf32> to vector<16x32xf32>
    %113 = arith.mulf %112, %111 : vector<16x32xf32>
    %114 = tpu.concatenate %110, %107, %113 in 0 : vector<16x32xf32>, vector<16x32xf32>, vector<16x32xf32> -> vector<48x32xf32>
    %cst_41 = arith.constant dense<0.000000e+00> : vector<16x32xf32>
    %115 = tpu.matmul %95, %114, %cst_41 {dimension_numbers = #tpu.dot_dimension_numbers<[1], [0], [0], [1], [0, 0, 1, 1], [], []>} : vector<16x48xf32>, vector<48x32xf32>, vector<16x32xf32> -> vector<16x32xf32>
    %116 = vector.broadcast %40 : vector<16x1xf32> to vector<16x32xf32>
    %117 = arith.addf %115, %116 : vector<16x32xf32>
    %118 = arith.addf %66, %117 : vector<16x32xf32>
    %cst_42 = arith.constant 0.000000e+00 : f32
    %119 = vector.broadcast %cst_42 : f32 to vector<16x32xf32>
    %120 = arith.maximumf %118, %119 : vector<16x32xf32>
    %c128 = arith.constant 128 : index
    %c0_43 = arith.constant 0 : index
    %121 = vector.load %arg1[%c128, %c0_43] : memref<536x128xf32, #tpu.memory_space<vmem>>, vector<96x16xf32>
    %cst_44 = arith.constant dense<0.000000e+00> : vector<96x32xf32>
    %122 = tpu.matmul %121, %120, %cst_44 {dimension_numbers = #tpu.dot_dimension_numbers<[1], [0], [0], [1], [0, 0, 1, 1], [], []>} : vector<96x16xf32>, vector<16x32xf32>, vector<96x32xf32> -> vector<96x32xf32>
    %123 = vector.extract_strided_slice %122 {offsets = [0, 0], sizes = [32, 32], strides = [1, 1]} : vector<96x32xf32> to vector<32x32xf32>
    %124 = vector.extract_strided_slice %122 {offsets = [32, 0], sizes = [32, 32], strides = [1, 1]} : vector<96x32xf32> to vector<32x32xf32>
    %125 = vector.extract_strided_slice %122 {offsets = [64, 0], sizes = [32, 32], strides = [1, 1]} : vector<96x32xf32> to vector<32x32xf32>
    %126 = tpu.iota {dimensions = array<i32: 1>} : vector<1x32xi32>
    %c16_i32_45 = arith.constant 16 : i32
    %c0_i32_46 = arith.constant 0 : i32
    %127 = arith.cmpi eq, %c16_i32_45, %c0_i32_46 : i32
    %c1_i32_47 = arith.constant 1 : i32
    %128 = arith.select %127, %c1_i32_47, %c16_i32_45 : i32
    %129 = vector.broadcast %128 : i32 to vector<1x32xi32>
    %130 = arith.remsi %126, %129 : vector<1x32xi32>
    %c0_i32_48 = arith.constant 0 : i32
    %131 = vector.broadcast %c0_i32_48 : i32 to vector<1x32xi32>
    %132 = arith.cmpi ne, %130, %131 : vector<1x32xi32>
    %c0_i32_49 = arith.constant 0 : i32
    %133 = vector.broadcast %c0_i32_49 : i32 to vector<1x32xi32>
    %134 = arith.cmpi slt, %130, %133 : vector<1x32xi32>
    %c0_i32_50 = arith.constant 0 : i32
    %135 = arith.cmpi slt, %128, %c0_i32_50 : i32
    %136 = vector.broadcast %135 : i1 to vector<1x32xi1>
    %137 = vector.broadcast %136 : vector<1x32xi1> to vector<1x32xi1>
    %138 = arith.xori %134, %137 : vector<1x32xi1>
    %139 = arith.andi %138, %132 : vector<1x32xi1>
    %140 = vector.broadcast %128 : i32 to vector<1x32xi32>
    %141 = arith.addi %130, %140 : vector<1x32xi32>
    %142 = arith.select %139, %141, %130 : vector<1x32xi1>, vector<1x32xi32>
    %c15_i32_51 = arith.constant 15 : i32
    %143 = vector.broadcast %c15_i32_51 : i32 to vector<1x32xi32>
    %144 = arith.cmpi eq, %142, %143 : vector<1x32xi32>
    %cst_52 = arith.constant 0.000000e+00 : f32
    %cst_53 = arith.constant 1.000000e+00 : f32
    %145 = vector.broadcast %cst_52 : f32 to vector<1x32xf32>
    %146 = vector.broadcast %cst_53 : f32 to vector<1x32xf32>
    %147 = arith.select %144, %145, %146 : vector<1x32xi1>, vector<1x32xf32>
    %c31_i32_54 = arith.constant 31 : i32
    %148 = tpu.dynamic_rotate %125 by %c31_i32_54 dim 1 : vector<32x32xf32>, i32 -> vector<32x32xf32>
    %149 = vector.broadcast %147 : vector<1x32xf32> to vector<32x32xf32>
    %150 = arith.mulf %149, %148 : vector<32x32xf32>
    %151 = arith.addf %124, %150 : vector<32x32xf32>
    %c320 = arith.constant 320 : index
    %c0_55 = arith.constant 0 : index
    %152 = vector.load %arg1[%c320, %c0_55] : memref<536x128xf32, #tpu.memory_space<vmem>>, vector<32x64xf32>
    %c352 = arith.constant 352 : index
    %c0_56 = arith.constant 0 : index
    %153 = vector.load %arg1[%c352, %c0_56] : memref<536x128xf32, #tpu.memory_space<vmem>>, vector<32x64xf32>
    %cst_57 = arith.constant dense<0.000000e+00> : vector<32x64xf32>
    %154 = tpu.matmul %123, %152, %cst_57 {dimension_numbers = #tpu.dot_dimension_numbers<[1], [0], [0], [1], [0, 0, 1, 1], [], []>} : vector<32x32xf32>, vector<32x64xf32>, vector<32x64xf32> -> vector<32x64xf32>
    %cst_58 = arith.constant dense<0.000000e+00> : vector<32x64xf32>
    %155 = tpu.matmul %151, %153, %cst_58 {dimension_numbers = #tpu.dot_dimension_numbers<[1], [0], [0], [1], [0, 0, 1, 1], [], []>} : vector<32x32xf32>, vector<32x64xf32>, vector<32x64xf32> -> vector<32x64xf32>
    %156 = arith.addf %154, %155 : vector<32x64xf32>
    %c288 = arith.constant 288 : index
    %c0_59 = arith.constant 0 : index
    %157 = vector.load %arg1[%c288, %c0_59] : memref<536x128xf32, #tpu.memory_space<vmem>>, vector<32x1xf32>
    %c288_60 = arith.constant 288 : index
    %c1_61 = arith.constant 1 : index
    %158 = vector.load %arg1[%c288_60, %c1_61] : memref<536x128xf32, #tpu.memory_space<vmem>>, vector<32x1xf32>
    %c288_62 = arith.constant 288 : index
    %c2_63 = arith.constant 2 : index
    %159 = vector.load %arg1[%c288_62, %c2_63] : memref<536x128xf32, #tpu.memory_space<vmem>>, vector<32x1xf32>
    %c288_64 = arith.constant 288 : index
    %c3_65 = arith.constant 3 : index
    %160 = vector.load %arg1[%c288_64, %c3_65] : memref<536x128xf32, #tpu.memory_space<vmem>>, vector<32x1xf32>
    %cst_66 = arith.constant dense<0.000000e+00> : vector<32xf32>
    %161 = vector.multi_reduction <add>, %156, %cst_66 [1] : vector<32x64xf32> to vector<32xf32>
    %162 = vector.shape_cast %161 : vector<32xf32> to vector<32x1xf32>
    %cst_67 = arith.constant 1.562500e-02 : f32
    %163 = vector.broadcast %cst_67 : f32 to vector<32x1xf32>
    %164 = arith.mulf %162, %163 : vector<32x1xf32>
    %165 = arith.mulf %156, %156 : vector<32x64xf32>
    %cst_68 = arith.constant dense<0.000000e+00> : vector<32xf32>
    %166 = vector.multi_reduction <add>, %165, %cst_68 [1] : vector<32x64xf32> to vector<32xf32>
    %167 = vector.shape_cast %166 : vector<32xf32> to vector<32x1xf32>
    %cst_69 = arith.constant 1.562500e-02 : f32
    %168 = vector.broadcast %cst_69 : f32 to vector<32x1xf32>
    %169 = arith.mulf %167, %168 : vector<32x1xf32>
    %170 = arith.mulf %164, %164 : vector<32x1xf32>
    %171 = arith.subf %169, %170 : vector<32x1xf32>
    %cst_70 = arith.constant 9.99999974E-6 : f32
    %172 = vector.broadcast %cst_70 : f32 to vector<32x1xf32>
    %173 = arith.addf %171, %172 : vector<32x1xf32>
    %174 = math.rsqrt %173 : vector<32x1xf32>
    %175 = arith.mulf %157, %174 : vector<32x1xf32>
    %176 = arith.mulf %164, %175 : vector<32x1xf32>
    %177 = arith.subf %158, %176 : vector<32x1xf32>
    %178 = vector.broadcast %175 : vector<32x1xf32> to vector<32x64xf32>
    %179 = arith.mulf %156, %178 : vector<32x64xf32>
    %180 = vector.broadcast %177 : vector<32x1xf32> to vector<32x64xf32>
    %181 = arith.addf %179, %180 : vector<32x64xf32>
    %cst_71 = arith.constant 0.000000e+00 : f32
    %182 = vector.broadcast %cst_71 : f32 to vector<32x64xf32>
    %183 = arith.cmpf ogt, %181, %182 : vector<32x64xf32>
    %cst_72 = arith.constant 0.00999999977 : f32
    %184 = vector.broadcast %cst_72 : f32 to vector<32x64xf32>
    %185 = arith.mulf %184, %181 : vector<32x64xf32>
    %186 = arith.select %183, %181, %185 : vector<32x64xi1>, vector<32x64xf32>
    %187 = tpu.iota {dimensions = array<i32: 1>} : vector<1x64xi32>
    %c32_i32 = arith.constant 32 : i32
    %c0_i32_73 = arith.constant 0 : i32
    %188 = arith.cmpi eq, %c32_i32, %c0_i32_73 : i32
    %c1_i32_74 = arith.constant 1 : i32
    %189 = arith.select %188, %c1_i32_74, %c32_i32 : i32
    %190 = vector.broadcast %189 : i32 to vector<1x64xi32>
    %191 = arith.remsi %187, %190 : vector<1x64xi32>
    %c0_i32_75 = arith.constant 0 : i32
    %192 = vector.broadcast %c0_i32_75 : i32 to vector<1x64xi32>
    %193 = arith.cmpi ne, %191, %192 : vector<1x64xi32>
    %c0_i32_76 = arith.constant 0 : i32
    %194 = vector.broadcast %c0_i32_76 : i32 to vector<1x64xi32>
    %195 = arith.cmpi slt, %191, %194 : vector<1x64xi32>
    %c0_i32_77 = arith.constant 0 : i32
    %196 = arith.cmpi slt, %189, %c0_i32_77 : i32
    %197 = vector.broadcast %196 : i1 to vector<1x64xi1>
    %198 = vector.broadcast %197 : vector<1x64xi1> to vector<1x64xi1>
    %199 = arith.xori %195, %198 : vector<1x64xi1>
    %200 = arith.andi %199, %193 : vector<1x64xi1>
    %201 = vector.broadcast %189 : i32 to vector<1x64xi32>
    %202 = arith.addi %191, %201 : vector<1x64xi32>
    %203 = arith.select %200, %202, %191 : vector<1x64xi1>, vector<1x64xi32>
    %c0_i32_78 = arith.constant 0 : i32
    %204 = vector.broadcast %c0_i32_78 : i32 to vector<1x64xi32>
    %205 = arith.cmpi eq, %203, %204 : vector<1x64xi32>
    %cst_79 = arith.constant 0.000000e+00 : f32
    %cst_80 = arith.constant 1.000000e+00 : f32
    %206 = vector.broadcast %cst_79 : f32 to vector<1x64xf32>
    %207 = vector.broadcast %cst_80 : f32 to vector<1x64xf32>
    %208 = arith.select %205, %206, %207 : vector<1x64xi1>, vector<1x64xf32>
    %c31_i32_81 = arith.constant 31 : i32
    %209 = vector.broadcast %c31_i32_81 : i32 to vector<1x64xi32>
    %210 = arith.cmpi eq, %203, %209 : vector<1x64xi32>
    %cst_82 = arith.constant 0.000000e+00 : f32
    %cst_83 = arith.constant 1.000000e+00 : f32
    %211 = vector.broadcast %cst_82 : f32 to vector<1x64xf32>
    %212 = vector.broadcast %cst_83 : f32 to vector<1x64xf32>
    %213 = arith.select %210, %211, %212 : vector<1x64xi1>, vector<1x64xf32>
    %c224 = arith.constant 224 : index
    %c0_84 = arith.constant 0 : index
    %214 = vector.load %arg1[%c224, %c0_84] : memref<536x128xf32, #tpu.memory_space<vmem>>, vector<32x96xf32>
    %c256 = arith.constant 256 : index
    %c0_85 = arith.constant 0 : index
    %215 = vector.load %arg1[%c256, %c0_85] : memref<536x128xf32, #tpu.memory_space<vmem>>, vector<32x96xf32>
    %c1_i32_86 = arith.constant 1 : i32
    %216 = tpu.dynamic_rotate %186 by %c1_i32_86 dim 1 : vector<32x64xf32>, i32 -> vector<32x64xf32>
    %217 = vector.broadcast %208 : vector<1x64xf32> to vector<32x64xf32>
    %218 = arith.mulf %217, %216 : vector<32x64xf32>
    %c63_i32 = arith.constant 63 : i32
    %219 = tpu.dynamic_rotate %186 by %c63_i32 dim 1 : vector<32x64xf32>, i32 -> vector<32x64xf32>
    %220 = vector.broadcast %213 : vector<1x64xf32> to vector<32x64xf32>
    %221 = arith.mulf %220, %219 : vector<32x64xf32>
    %222 = tpu.concatenate %218, %186, %221 in 0 : vector<32x64xf32>, vector<32x64xf32>, vector<32x64xf32> -> vector<96x64xf32>
    %cst_87 = arith.constant dense<0.000000e+00> : vector<32x64xf32>
    %223 = tpu.matmul %214, %222, %cst_87 {dimension_numbers = #tpu.dot_dimension_numbers<[1], [0], [0], [1], [0, 0, 1, 1], [], []>} : vector<32x96xf32>, vector<96x64xf32>, vector<32x64xf32> -> vector<32x64xf32>
    %224 = vector.broadcast %159 : vector<32x1xf32> to vector<32x64xf32>
    %225 = arith.addf %223, %224 : vector<32x64xf32>
    %cst_88 = arith.constant 0.000000e+00 : f32
    %226 = vector.broadcast %cst_88 : f32 to vector<32x64xf32>
    %227 = arith.maximumf %225, %226 : vector<32x64xf32>
    %c1_i32_89 = arith.constant 1 : i32
    %228 = tpu.dynamic_rotate %227 by %c1_i32_89 dim 1 : vector<32x64xf32>, i32 -> vector<32x64xf32>
    %229 = vector.broadcast %208 : vector<1x64xf32> to vector<32x64xf32>
    %230 = arith.mulf %229, %228 : vector<32x64xf32>
    %c63_i32_90 = arith.constant 63 : i32
    %231 = tpu.dynamic_rotate %227 by %c63_i32_90 dim 1 : vector<32x64xf32>, i32 -> vector<32x64xf32>
    %232 = vector.broadcast %213 : vector<1x64xf32> to vector<32x64xf32>
    %233 = arith.mulf %232, %231 : vector<32x64xf32>
    %234 = tpu.concatenate %230, %227, %233 in 0 : vector<32x64xf32>, vector<32x64xf32>, vector<32x64xf32> -> vector<96x64xf32>
    %cst_91 = arith.constant dense<0.000000e+00> : vector<32x64xf32>
    %235 = tpu.matmul %215, %234, %cst_91 {dimension_numbers = #tpu.dot_dimension_numbers<[1], [0], [0], [1], [0, 0, 1, 1], [], []>} : vector<32x96xf32>, vector<96x64xf32>, vector<32x64xf32> -> vector<32x64xf32>
    %236 = vector.broadcast %160 : vector<32x1xf32> to vector<32x64xf32>
    %237 = arith.addf %235, %236 : vector<32x64xf32>
    %238 = arith.addf %186, %237 : vector<32x64xf32>
    %cst_92 = arith.constant 0.000000e+00 : f32
    %239 = vector.broadcast %cst_92 : f32 to vector<32x64xf32>
    %240 = arith.maximumf %238, %239 : vector<32x64xf32>
    %c384 = arith.constant 384 : index
    %c0_93 = arith.constant 0 : index
    %241 = vector.load %arg1[%c384, %c0_93] : memref<536x128xf32, #tpu.memory_space<vmem>>, vector<3x32xf32>
    %cst_94 = arith.constant dense<0.000000e+00> : vector<3x64xf32>
    %242 = tpu.matmul %241, %240, %cst_94 {dimension_numbers = #tpu.dot_dimension_numbers<[1], [0], [0], [1], [0, 0, 1, 1], [], []>} : vector<3x32xf32>, vector<32x64xf32>, vector<3x64xf32> -> vector<3x64xf32>
    %243 = vector.extract_strided_slice %242 {offsets = [0, 0], sizes = [1, 64], strides = [1, 1]} : vector<3x64xf32> to vector<1x64xf32>
    %244 = vector.extract_strided_slice %242 {offsets = [1, 0], sizes = [1, 64], strides = [1, 1]} : vector<3x64xf32> to vector<1x64xf32>
    %245 = vector.extract_strided_slice %242 {offsets = [2, 0], sizes = [1, 64], strides = [1, 1]} : vector<3x64xf32> to vector<1x64xf32>
    %246 = tpu.iota {dimensions = array<i32: 1>} : vector<1x64xi32>
    %c32_i32_95 = arith.constant 32 : i32
    %c0_i32_96 = arith.constant 0 : i32
    %247 = arith.cmpi eq, %c32_i32_95, %c0_i32_96 : i32
    %c1_i32_97 = arith.constant 1 : i32
    %248 = arith.select %247, %c1_i32_97, %c32_i32_95 : i32
    %249 = vector.broadcast %248 : i32 to vector<1x64xi32>
    %250 = arith.remsi %246, %249 : vector<1x64xi32>
    %c0_i32_98 = arith.constant 0 : i32
    %251 = vector.broadcast %c0_i32_98 : i32 to vector<1x64xi32>
    %252 = arith.cmpi ne, %250, %251 : vector<1x64xi32>
    %c0_i32_99 = arith.constant 0 : i32
    %253 = vector.broadcast %c0_i32_99 : i32 to vector<1x64xi32>
    %254 = arith.cmpi slt, %250, %253 : vector<1x64xi32>
    %c0_i32_100 = arith.constant 0 : i32
    %255 = arith.cmpi slt, %248, %c0_i32_100 : i32
    %256 = vector.broadcast %255 : i1 to vector<1x64xi1>
    %257 = vector.broadcast %256 : vector<1x64xi1> to vector<1x64xi1>
    %258 = arith.xori %254, %257 : vector<1x64xi1>
    %259 = arith.andi %258, %252 : vector<1x64xi1>
    %260 = vector.broadcast %248 : i32 to vector<1x64xi32>
    %261 = arith.addi %250, %260 : vector<1x64xi32>
    %262 = arith.select %259, %261, %250 : vector<1x64xi1>, vector<1x64xi32>
    %c31_i32_101 = arith.constant 31 : i32
    %263 = vector.broadcast %c31_i32_101 : i32 to vector<1x64xi32>
    %264 = arith.cmpi eq, %262, %263 : vector<1x64xi32>
    %cst_102 = arith.constant 0.000000e+00 : f32
    %cst_103 = arith.constant 1.000000e+00 : f32
    %265 = vector.broadcast %cst_102 : f32 to vector<1x64xf32>
    %266 = vector.broadcast %cst_103 : f32 to vector<1x64xf32>
    %267 = arith.select %264, %265, %266 : vector<1x64xi1>, vector<1x64xf32>
    %c63_i32_104 = arith.constant 63 : i32
    %268 = tpu.dynamic_rotate %245 by %c63_i32_104 dim 1 : vector<1x64xf32>, i32 -> vector<1x64xf32>
    %269 = arith.mulf %267, %268 : vector<1x64xf32>
    %270 = arith.addf %244, %269 : vector<1x64xf32>
    %c400 = arith.constant 400 : index
    %c0_105 = arith.constant 0 : index
    %271 = vector.load %arg1[%c400, %c0_105] : memref<536x128xf32, #tpu.memory_space<vmem>>, vector<64x128xf32>
    %c464 = arith.constant 464 : index
    %c0_106 = arith.constant 0 : index
    %272 = vector.load %arg1[%c464, %c0_106] : memref<536x128xf32, #tpu.memory_space<vmem>>, vector<64x128xf32>
    %cst_107 = arith.constant dense<0.000000e+00> : vector<1x128xf32>
    %273 = tpu.matmul %243, %271, %cst_107 {dimension_numbers = #tpu.dot_dimension_numbers<[1], [0], [0], [1], [0, 0, 1, 1], [], []>} : vector<1x64xf32>, vector<64x128xf32>, vector<1x128xf32> -> vector<1x128xf32>
    %cst_108 = arith.constant dense<0.000000e+00> : vector<1x128xf32>
    %274 = tpu.matmul %270, %272, %cst_108 {dimension_numbers = #tpu.dot_dimension_numbers<[1], [0], [0], [1], [0, 0, 1, 1], [], []>} : vector<1x64xf32>, vector<64x128xf32>, vector<1x128xf32> -> vector<1x128xf32>
    %275 = arith.addf %273, %274 : vector<1x128xf32>
    %c392 = arith.constant 392 : index
    %c0_109 = arith.constant 0 : index
    %276 = vector.load %arg1[%c392, %c0_109] : memref<536x128xf32, #tpu.memory_space<vmem>>, vector<1x1xf32>
    %c392_110 = arith.constant 392 : index
    %c1_111 = arith.constant 1 : index
    %277 = vector.load %arg1[%c392_110, %c1_111] : memref<536x128xf32, #tpu.memory_space<vmem>>, vector<1x1xf32>
    %cst_112 = arith.constant dense<0.000000e+00> : vector<1xf32>
    %278 = vector.multi_reduction <add>, %275, %cst_112 [1] : vector<1x128xf32> to vector<1xf32>
    %279 = vector.shape_cast %278 : vector<1xf32> to vector<1x1xf32>
    %cst_113 = arith.constant 7.812500e-03 : f32
    %280 = vector.broadcast %cst_113 : f32 to vector<1x1xf32>
    %281 = arith.mulf %279, %280 : vector<1x1xf32>
    %282 = arith.mulf %275, %275 : vector<1x128xf32>
    %cst_114 = arith.constant dense<0.000000e+00> : vector<1xf32>
    %283 = vector.multi_reduction <add>, %282, %cst_114 [1] : vector<1x128xf32> to vector<1xf32>
    %284 = vector.shape_cast %283 : vector<1xf32> to vector<1x1xf32>
    %cst_115 = arith.constant 7.812500e-03 : f32
    %285 = vector.broadcast %cst_115 : f32 to vector<1x1xf32>
    %286 = arith.mulf %284, %285 : vector<1x1xf32>
    %287 = arith.mulf %281, %281 : vector<1x1xf32>
    %288 = arith.subf %286, %287 : vector<1x1xf32>
    %cst_116 = arith.constant 9.99999974E-6 : f32
    %289 = vector.broadcast %cst_116 : f32 to vector<1x1xf32>
    %290 = arith.addf %288, %289 : vector<1x1xf32>
    %291 = math.rsqrt %290 : vector<1x1xf32>
    %292 = arith.mulf %276, %291 : vector<1x1xf32>
    %293 = arith.mulf %281, %292 : vector<1x1xf32>
    %294 = arith.subf %277, %293 : vector<1x1xf32>
    %295 = vector.broadcast %292 : vector<1x1xf32> to vector<1x128xf32>
    %296 = arith.mulf %275, %295 : vector<1x128xf32>
    %297 = vector.broadcast %294 : vector<1x1xf32> to vector<1x128xf32>
    %298 = arith.addf %296, %297 : vector<1x128xf32>
    %cst_117 = arith.constant 0.000000e+00 : f32
    %299 = vector.broadcast %cst_117 : f32 to vector<1x128xf32>
    %300 = arith.cmpf ogt, %298, %299 : vector<1x128xf32>
    %cst_118 = arith.constant 0.00999999977 : f32
    %301 = vector.broadcast %cst_118 : f32 to vector<1x128xf32>
    %302 = arith.mulf %301, %298 : vector<1x128xf32>
    %303 = arith.select %300, %298, %302 : vector<1x128xi1>, vector<1x128xf32>
    %304 = tpu.iota {dimensions = array<i32: 1>} : vector<1x128xi32>
    %c64_i32 = arith.constant 64 : i32
    %c0_i32_119 = arith.constant 0 : i32
    %305 = arith.cmpi eq, %c64_i32, %c0_i32_119 : i32
    %c1_i32_120 = arith.constant 1 : i32
    %306 = arith.select %305, %c1_i32_120, %c64_i32 : i32
    %307 = vector.broadcast %306 : i32 to vector<1x128xi32>
    %308 = arith.remsi %304, %307 : vector<1x128xi32>
    %c0_i32_121 = arith.constant 0 : i32
    %309 = vector.broadcast %c0_i32_121 : i32 to vector<1x128xi32>
    %310 = arith.cmpi ne, %308, %309 : vector<1x128xi32>
    %c0_i32_122 = arith.constant 0 : i32
    %311 = vector.broadcast %c0_i32_122 : i32 to vector<1x128xi32>
    %312 = arith.cmpi slt, %308, %311 : vector<1x128xi32>
    %c0_i32_123 = arith.constant 0 : i32
    %313 = arith.cmpi slt, %306, %c0_i32_123 : i32
    %314 = vector.broadcast %313 : i1 to vector<1x128xi1>
    %315 = vector.broadcast %314 : vector<1x128xi1> to vector<1x128xi1>
    %316 = arith.xori %312, %315 : vector<1x128xi1>
    %317 = arith.andi %316, %310 : vector<1x128xi1>
    %318 = vector.broadcast %306 : i32 to vector<1x128xi32>
    %319 = arith.addi %308, %318 : vector<1x128xi32>
    %320 = arith.select %317, %319, %308 : vector<1x128xi1>, vector<1x128xi32>
    %c0_i32_124 = arith.constant 0 : i32
    %321 = vector.broadcast %c0_i32_124 : i32 to vector<1x128xi32>
    %322 = arith.cmpi eq, %320, %321 : vector<1x128xi32>
    %cst_125 = arith.constant 0.000000e+00 : f32
    %cst_126 = arith.constant 1.000000e+00 : f32
    %323 = vector.broadcast %cst_125 : f32 to vector<1x128xf32>
    %324 = vector.broadcast %cst_126 : f32 to vector<1x128xf32>
    %325 = arith.select %322, %323, %324 : vector<1x128xi1>, vector<1x128xf32>
    %c63_i32_127 = arith.constant 63 : i32
    %326 = vector.broadcast %c63_i32_127 : i32 to vector<1x128xi32>
    %327 = arith.cmpi eq, %320, %326 : vector<1x128xi32>
    %cst_128 = arith.constant 0.000000e+00 : f32
    %cst_129 = arith.constant 1.000000e+00 : f32
    %328 = vector.broadcast %cst_128 : f32 to vector<1x128xf32>
    %329 = vector.broadcast %cst_129 : f32 to vector<1x128xf32>
    %330 = arith.select %327, %328, %329 : vector<1x128xi1>, vector<1x128xf32>
    %c392_130 = arith.constant 392 : index
    %c2_131 = arith.constant 2 : index
    %331 = vector.load %arg1[%c392_130, %c2_131] : memref<536x128xf32, #tpu.memory_space<vmem>>, vector<1x1xf32>
    %c392_132 = arith.constant 392 : index
    %c3_133 = arith.constant 3 : index
    %332 = vector.load %arg1[%c392_132, %c3_133] : memref<536x128xf32, #tpu.memory_space<vmem>>, vector<1x1xf32>
    %c392_134 = arith.constant 392 : index
    %c4 = arith.constant 4 : index
    %333 = vector.load %arg1[%c392_134, %c4] : memref<536x128xf32, #tpu.memory_space<vmem>>, vector<1x1xf32>
    %c392_135 = arith.constant 392 : index
    %c5 = arith.constant 5 : index
    %334 = vector.load %arg1[%c392_135, %c5] : memref<536x128xf32, #tpu.memory_space<vmem>>, vector<1x1xf32>
    %c1_i32_136 = arith.constant 1 : i32
    %335 = tpu.dynamic_rotate %303 by %c1_i32_136 dim 1 : vector<1x128xf32>, i32 -> vector<1x128xf32>
    %336 = arith.mulf %325, %335 : vector<1x128xf32>
    %c127_i32 = arith.constant 127 : i32
    %337 = tpu.dynamic_rotate %303 by %c127_i32 dim 1 : vector<1x128xf32>, i32 -> vector<1x128xf32>
    %338 = arith.mulf %330, %337 : vector<1x128xf32>
    %339 = vector.broadcast %331 : vector<1x1xf32> to vector<1x128xf32>
    %340 = arith.mulf %339, %336 : vector<1x128xf32>
    %341 = vector.broadcast %332 : vector<1x1xf32> to vector<1x128xf32>
    %342 = arith.mulf %341, %303 : vector<1x128xf32>
    %343 = arith.addf %340, %342 : vector<1x128xf32>
    %344 = vector.broadcast %333 : vector<1x1xf32> to vector<1x128xf32>
    %345 = arith.mulf %344, %338 : vector<1x128xf32>
    %346 = arith.addf %343, %345 : vector<1x128xf32>
    %347 = vector.broadcast %334 : vector<1x1xf32> to vector<1x128xf32>
    %348 = arith.addf %346, %347 : vector<1x128xf32>
    %cst_137 = arith.constant 0.000000e+00 : f32
    %349 = vector.broadcast %cst_137 : f32 to vector<1x128xf32>
    %350 = arith.maximumf %348, %349 : vector<1x128xf32>
    %c392_138 = arith.constant 392 : index
    %c6 = arith.constant 6 : index
    %351 = vector.load %arg1[%c392_138, %c6] : memref<536x128xf32, #tpu.memory_space<vmem>>, vector<1x1xf32>
    %c392_139 = arith.constant 392 : index
    %c7 = arith.constant 7 : index
    %352 = vector.load %arg1[%c392_139, %c7] : memref<536x128xf32, #tpu.memory_space<vmem>>, vector<1x1xf32>
    %c392_140 = arith.constant 392 : index
    %c8 = arith.constant 8 : index
    %353 = vector.load %arg1[%c392_140, %c8] : memref<536x128xf32, #tpu.memory_space<vmem>>, vector<1x1xf32>
    %c392_141 = arith.constant 392 : index
    %c9 = arith.constant 9 : index
    %354 = vector.load %arg1[%c392_141, %c9] : memref<536x128xf32, #tpu.memory_space<vmem>>, vector<1x1xf32>
    %c1_i32_142 = arith.constant 1 : i32
    %355 = tpu.dynamic_rotate %350 by %c1_i32_142 dim 1 : vector<1x128xf32>, i32 -> vector<1x128xf32>
    %356 = arith.mulf %325, %355 : vector<1x128xf32>
    %c127_i32_143 = arith.constant 127 : i32
    %357 = tpu.dynamic_rotate %350 by %c127_i32_143 dim 1 : vector<1x128xf32>, i32 -> vector<1x128xf32>
    %358 = arith.mulf %330, %357 : vector<1x128xf32>
    %359 = vector.broadcast %351 : vector<1x1xf32> to vector<1x128xf32>
    %360 = arith.mulf %359, %356 : vector<1x128xf32>
    %361 = vector.broadcast %352 : vector<1x1xf32> to vector<1x128xf32>
    %362 = arith.mulf %361, %350 : vector<1x128xf32>
    %363 = arith.addf %360, %362 : vector<1x128xf32>
    %364 = vector.broadcast %353 : vector<1x1xf32> to vector<1x128xf32>
    %365 = arith.mulf %364, %358 : vector<1x128xf32>
    %366 = arith.addf %363, %365 : vector<1x128xf32>
    %367 = vector.broadcast %354 : vector<1x1xf32> to vector<1x128xf32>
    %368 = arith.addf %366, %367 : vector<1x128xf32>
    %369 = arith.addf %303, %368 : vector<1x128xf32>
    %cst_144 = arith.constant 0.000000e+00 : f32
    %370 = vector.broadcast %cst_144 : f32 to vector<1x128xf32>
    %371 = arith.maximumf %369, %370 : vector<1x128xf32>
    %372 = tpu.iota {dimensions = array<i32: 1>} : vector<1x128xi32>
    %c64_i32_145 = arith.constant 64 : i32
    %c0_i32_146 = arith.constant 0 : i32
    %373 = arith.cmpi eq, %c64_i32_145, %c0_i32_146 : i32
    %c1_i32_147 = arith.constant 1 : i32
    %374 = arith.select %373, %c1_i32_147, %c64_i32_145 : i32
    %375 = vector.broadcast %374 : i32 to vector<1x128xi32>
    %376 = arith.remsi %372, %375 : vector<1x128xi32>
    %c0_i32_148 = arith.constant 0 : i32
    %377 = vector.broadcast %c0_i32_148 : i32 to vector<1x128xi32>
    %378 = arith.cmpi ne, %376, %377 : vector<1x128xi32>
    %c0_i32_149 = arith.constant 0 : i32
    %379 = vector.broadcast %c0_i32_149 : i32 to vector<1x128xi32>
    %380 = arith.cmpi slt, %376, %379 : vector<1x128xi32>
    %c0_i32_150 = arith.constant 0 : i32
    %381 = arith.cmpi slt, %374, %c0_i32_150 : i32
    %382 = vector.broadcast %381 : i1 to vector<1x128xi1>
    %383 = vector.broadcast %382 : vector<1x128xi1> to vector<1x128xi1>
    %384 = arith.xori %380, %383 : vector<1x128xi1>
    %385 = arith.andi %384, %378 : vector<1x128xi1>
    %386 = vector.broadcast %374 : i32 to vector<1x128xi32>
    %387 = arith.addi %376, %386 : vector<1x128xi32>
    %388 = arith.select %385, %387, %376 : vector<1x128xi1>, vector<1x128xi32>
    %c0_i32_151 = arith.constant 0 : i32
    %389 = vector.broadcast %c0_i32_151 : i32 to vector<1x128xi32>
    %390 = arith.cmpi eq, %388, %389 : vector<1x128xi32>
    %cst_152 = arith.constant 0.000000e+00 : f32
    %cst_153 = arith.constant 1.000000e+00 : f32
    %391 = vector.broadcast %cst_152 : f32 to vector<1x128xf32>
    %392 = vector.broadcast %cst_153 : f32 to vector<1x128xf32>
    %393 = arith.select %390, %391, %392 : vector<1x128xi1>, vector<1x128xf32>
    %c63_i32_154 = arith.constant 63 : i32
    %394 = vector.broadcast %c63_i32_154 : i32 to vector<1x128xi32>
    %395 = arith.cmpi eq, %388, %394 : vector<1x128xi32>
    %cst_155 = arith.constant 0.000000e+00 : f32
    %cst_156 = arith.constant 1.000000e+00 : f32
    %396 = vector.broadcast %cst_155 : f32 to vector<1x128xf32>
    %397 = vector.broadcast %cst_156 : f32 to vector<1x128xf32>
    %398 = arith.select %395, %396, %397 : vector<1x128xi1>, vector<1x128xf32>
    %c1_i32_157 = arith.constant 1 : i32
    %399 = tpu.dynamic_rotate %371 by %c1_i32_157 dim 1 : vector<1x128xf32>, i32 -> vector<1x128xf32>
    %400 = arith.mulf %393, %399 : vector<1x128xf32>
    %c127_i32_158 = arith.constant 127 : i32
    %401 = tpu.dynamic_rotate %371 by %c127_i32_158 dim 1 : vector<1x128xf32>, i32 -> vector<1x128xf32>
    %402 = arith.mulf %398, %401 : vector<1x128xf32>
    %c528 = arith.constant 528 : index
    %c0_159 = arith.constant 0 : index
    %403 = vector.load %arg1[%c528, %c0_159] : memref<536x128xf32, #tpu.memory_space<vmem>>, vector<1x1xf32>
    %404 = vector.broadcast %403 : vector<1x1xf32> to vector<1x128xf32>
    %405 = arith.mulf %404, %400 : vector<1x128xf32>
    %c528_160 = arith.constant 528 : index
    %c1_161 = arith.constant 1 : index
    %406 = vector.load %arg1[%c528_160, %c1_161] : memref<536x128xf32, #tpu.memory_space<vmem>>, vector<1x1xf32>
    %407 = vector.broadcast %406 : vector<1x1xf32> to vector<1x128xf32>
    %408 = arith.mulf %407, %371 : vector<1x128xf32>
    %409 = arith.addf %405, %408 : vector<1x128xf32>
    %c528_162 = arith.constant 528 : index
    %c2_163 = arith.constant 2 : index
    %410 = vector.load %arg1[%c528_162, %c2_163] : memref<536x128xf32, #tpu.memory_space<vmem>>, vector<1x1xf32>
    %411 = vector.broadcast %410 : vector<1x1xf32> to vector<1x128xf32>
    %412 = arith.mulf %411, %402 : vector<1x128xf32>
    %413 = arith.addf %409, %412 : vector<1x128xf32>
    %c528_164 = arith.constant 528 : index
    %c3_165 = arith.constant 3 : index
    %414 = vector.load %arg1[%c528_164, %c3_165] : memref<536x128xf32, #tpu.memory_space<vmem>>, vector<1x1xf32>
    %415 = vector.broadcast %414 : vector<1x1xf32> to vector<1x128xf32>
    %416 = arith.addf %413, %415 : vector<1x128xf32>
    %c0_166 = arith.constant 0 : index
    %c0_167 = arith.constant 0 : index
    %417 = vector.load %arg2[%c0_166, %c0_167] : memref<1x128xf32, #tpu.memory_space<vmem>>, vector<1x128xf32>
    tpu.vector_store %arg2[%c0_166, %c0_167], %416 {strides = array<i32>} : memref<1x128xf32, #tpu.memory_space<vmem>>, vector<1x128xf32>,
    return
  }
}

</mosaic_0001>

<bundles_post_ra>
// kernel: fwd.1
= control target key start
LH: loop header
LB: loop body
LE: loop exit
PB: predicated region body
PF: predicated region fallthrough
CT: control target
= control target key end

     0   :  { %7 = vsyncpa [#allocation3], 0  ;;  %s2522_s9 = smov [#allocation2]   ;;  %s2986_s0 = inlined_call_operand.vmem [shape: f32[4,16], index: 0, kind: input, shape index: {}]   ;;  %s2987_s1 = inlined_call_operand.hbm [shape: f32[536,128], index: 1, kind: input, shape index: {}]   ;;  %s2988_s2 = inlined_call_operand.vmem [shape: f32[1,128], index: 2, kind: output, shape index: {}]  }
   0x1   :  { %s15_s10 = sshll.u32 %s2522_s9, 4  ;;  %s16_s10 = int_to_ptr.vmem [resolvable:$true] %s15_s10 }
   0x2   :  { %s2508_s11 = scalar_lea.vmem %s16_s10, 8576  ;;  %p2513_p1 = scmp.lt.s32.totalorder %s16_s10, %s16_s10 }
   0x3   :  { %p2509_p0 = scmp.ne.s32.totalorder %s16_s10, %s2508_s11  ;;  %p2514_p2 = scmp.lt.s32.totalorder %s2508_s11, %s2508_s11 }
   0x5   :  { %p2515_p3 = por %p2514_p2, %p2513_p1 }
   0x7   :  { %p2516_p4 = pnand %p2515_p3, %p2509_p0 }
   0x9   :  { %2519 = shalt.err (!%p2516_p4)
}
   0xa   :  { %s2523_s12 = smov 128   ;;  %s2524_s13 = smov 8  }
   0xb   :  { %21 = dma.hbm_to_vmem [thread:$0]  %s2987_s1, 8576, %s16_s10, [#allocation3], %s2523_s12, %s2523_s12, %s2524_s13  }
   0xc   :  { %2520 = dma.done.wait [#allocation3], 8576  }
   0xd   :  { %2521 = vsyncadd [#allocation3], 4294958720  ;;  %vm51_vm0 = vcmask 1043456   ;;  %vm32_vm1 = vcmask 31744   ;;  %v25_v0 = vld [vmem:[%s2986_s0] sm:$0xf]  ;;  %v150_v24 = vlaneseq }
   0xe   :  { %v26_v1 = vld [vmem:[#allocation2] sm:$0xff]  ;;  %v27_v2 = vld [vmem:[#allocation2 + $0x8] sm:$0xff]  ;;  %2220 = vmatprep.subr.msk.mxu0 %vm51_vm0, %v25_v0  ;;  %v28_v3 = vld [vmem:[#allocation2 + $0x10] sm:$0xff]  ;;  %s2525_s0 = smov 16   ;;  %vm166_vm2 = vcmask 1047680   ;;  %s2526_s1 = smov 127  }
   0xf   :  { %2222 = vmatprep.mubr.msk.f32.mxu0 %vm32_vm1, %v26_v1  ;;  %2221 = vmatpush3.msk.msra.mxu0 %vm51_vm0, %v25_v0  ;;  %v29_v4 = vld [vmem:[#allocation2 + $0x18] sm:$0xff]  ;;  %v30_v5 = vld [vmem:[#allocation2 + $0x20] sm:$0xff]  ;;  %v31_v6 = vld [vmem:[#allocation2 + $0x28] sm:$0xff]  ;;  %v2572_v25 = vand.u32 127, %v150_v24  ;;  %v2527_v27 = vmov 1.0   ;;  %vm195_vm4 = vcmask 130048  }
  0x10   :  { %2223 = vmatmul.mubr.msk.f32.vlgmr.msra.gmra.mxu0 %vm32_vm1, %v27_v2  ;;  %v194_v17 = vld [vmem:[#allocation2 + $0x78] sm:$0xff]  ;;  %v193_v18 = vld [vmem:[#allocation2 + $0x70] sm:$0xff]  ;;  %v192_v19 = vld [vmem:[#allocation2 + $0x68] sm:$0xff]  ;;  %vm360_vm5 = vcmask 261120   ;;  %v2528_v48 = vmov 0   ;;  %v2529_v63 = vmov 1  }
  0x11   :  { %2225 = vmatprep.mubr.msk.f32.mxu0 %vm32_vm1, %v28_v3  ;;  %2231 = vmatprep.subr.mxu1 %v194_v17  ;;  %v156_v26 = vand.u32 7, %v2572_v25  ;;  %v191_v35 = vld [vmem:[#allocation2 + $0x60] sm:$0xff]  ;;  %v2586_v0 = vld [vmem:[#allocation2 + $0x58] sm:$0xff]  ;;  %v2589_v3 = vld [vmem:[#allocation2 + $0x50] sm:$0xff]  ;;  %s2530_s18 = smov 1   ;;  %s2531_s19 = smov 32  }
  0x12   :  { %2232 = vmatpush3.msra.mxu1 %v194_v17  ;;  %2457 = vset.pattern.permute.xlu1 %v2528_v48  ;;  %vm451_vm8 = vcmask 1047808   ;;  %vm492_vm9 = vcmask 392192   ;;  %s2532_s20 = smov 97   ;;  %vm1126_vm12 = vcmask 523264   ;;  %s2535_s21 = smov 64  }
  0x13   :  { %2233 = vmatprep.subr.mxu1 %v193_v18  ;;  %vm164_vm3 = vcmp.eq.s32.totalorder %v156_v26, 7  ;;  %2458 = vset.pattern.permute.xlu0 %v2529_v63  ;;  %s2536_s22 = smov 65  }
  0x14   :  { %2226 = vmatmul.mubr.msk.f32.gmra.mxu0 %vm32_vm1, %v29_v4  ;;  %2234 = vmatpush3.msra.mxu1 %v193_v18  ;;  %v165_v28 = vsel %vm164_vm3, 0.0, %v2527_v27 }
  0x15   :  { %2228 = vmatprep.mubr.msk.f32.mxu0 %vm32_vm1, %v30_v5  ;;  %2238 = vmatprep.subr.mxu1 %v192_v19 }
  0x18   :  { %2229 = vmatmul.mubr.msk.f32.gmra.mxu0 %vm32_vm1, %v31_v6  ;;  %vm1291_vm1 = vcmask 1048064  }
  0xd0   :  { %v2224_v7 = vpop.f32.mrf.mxu0 }
  0xd2   :  { %v121_v8 = vpop.f32.mrf.mxu0 }
  0xd4   :  { %v2227_v9 = vpop.f32.mrf.mxu0 }
  0xd6   :  { %v131_v10 = vpop.f32.mrf.mxu0 }
  0xd8   :  { %v2230_v11 = vpop.f32.mrf.mxu0 }
  0xda   :  { %v141_v12 = vpop.f32.mrf.mxu0 }
  0xdb   :  { %167 = vrot.lane.b32.xlu0 %v141_v12, %s2525_s0 }
  0xdf   :  { %170 = vrot.lane.b32.xlu0 %v2230_v11, %s2525_s0 }
 0x14d   :  { %v168_v13 = vpop.permute.xlu0 %167 }
 0x14e   :  { %v169_v14 = vsel %vm166_vm2, %v168_v13, %v141_v12 }
 0x14f   :  { %173 = vrot.lane.b32.xlu1 %v169_v14, %s2525_s0 }
 0x151   :  { %v171_v15 = vpop.permute.xlu0 %170 }
 0x152   :  { %v172_v16 = vsel %vm166_vm2, %v171_v15, %v2230_v11 }
 0x153   :  { %175 = vrot.lane.b32.xlu1 %v172_v16, %s2525_s0 }
 0x1c1   :  { %v174_v20 = vpop.permute.xlu1 %173 }
 0x1c2   :  { %v177_v21 = vsel %vm166_vm2, %v174_v20, %v141_v12 }
 0x1c3   :  { %181 = vrot.lane.b32.xlu0 %v177_v21, %s2526_s1 }
 0x1c5   :  { %v176_v22 = vpop.permute.xlu1 %175 }
 0x1c6   :  { %v178_v23 = vsel %vm166_vm2, %v176_v22, %v2230_v11  ;;  %vm1372_vm2 = vcmask 785408  }
 0x1c7   :  { %183 = vrot.lane.b32.xlu1 %v178_v23, %s2526_s1 }
 0x235   :  { %v182_v29 = vpop.permute.xlu0 %181 }
 0x236   :  { %v187_v30 = vmul.f32 %v182_v29, %v165_v28 }
 0x238   :  { %v189_v31 = vadd.f32 %v187_v30, %v131_v10 }
 0x239   :  { %v184_v32 = vpop.permute.xlu1 %183 }
 0x23a   :  { %v188_v33 = vmul.f32 %v184_v32, %v165_v28  ;;  %2235 = vmatprep.mubr.msk.f32.mxu1 %vm195_vm4, %v189_v31  ;;  %v447_v32 = vld [vmem:[#allocation2 + $0x30] sm:$0xff] }
 0x23b   :  { %2257 = vmatprep.mubr.msk.f32.mxu0 %vm492_vm9, %v447_v32  ;;  %v705_v32 = vld [vmem:[#allocation2 + $0xb0] sm:$0xff] }
 0x23c   :  { %v190_v34 = vadd.f32 %v2227_v9, %v188_v33 }
 0x23e   :  { %2236 = vmatmul.mubr.msk.f32.vlgmr.msra.gmra.mxu1 %vm195_vm4, %v190_v34 }
 0x23f   :  { %2239 = vmatpush3.msra.mxu1 %v192_v19  ;;  %2242 = vmatprep.mubr.msk.f32.mxu1 %vm195_vm4, %v121_v8 }
 0x240   :  { %2240 = vmatprep.subr.mxu1 %v191_v35 }
 0x241   :  { %2241 = vmatpush3.msra.mxu1 %v191_v35  ;;  %v2533_v35 = vmov 2  }
 0x242   :  { %2243 = vmatmul.mubr.msk.f32.vlgmr.msra.gmra.mxu1 %vm195_vm4, %v2224_v7 }
 0x2fe   :  { %v2237_v36 = vpop.f32.mrf.mxu1 }
 0x300   :  { %v268_v37 = vpop.f32.mrf.mxu1 }
 0x302   :  { %v2244_v38 = vpop.f32.mrf.mxu1 }
 0x303   :  { %v355_v39 = vadd.f32 %v2244_v38, %v2237_v36  ;;  %v435_v36 = vand.u32 15, %v2572_v25 }
 0x304   :  { %v349_v40 = vpop.f32.mrf.mxu1 }
 0x305   :  { %v350_v41 = vadd.f32 %v349_v40, %v268_v37  ;;  %v364_v42 = vsel %vm360_vm5, %v355_v39, 0.0  ;;  %v370_v43 = vmul.f32 %v355_v39, %v355_v39  ;;  %vm445_vm10 = vcmp.eq.s32.totalorder %v435_v36, 15 }
 0x306   :  { %365 = vadd.xlane.f32.xlu0 %v364_v42  ;;  %v2626_v37 = vsel %vm445_vm10, 0.0, %v2527_v27  ;;  %vm443_vm11 = vcmp.eq.s32.totalorder %v435_v36, 0  ;;  %v709_v36 = vld [vmem:[#allocation2 + $0xd0] sm:$0xff] }
 0x307   :  { %v361_v44 = vsel %vm360_vm5, %v350_v41, 0.0  ;;  %v374_v45 = vsel %vm360_vm5, %v370_v43, 0.0  ;;  %v369_v46 = vmul.f32 %v350_v41, %v350_v41  ;;  %v2631_v42 = vsel %vm443_vm11, 0.0, %v2527_v27 }
 0x308   :  { %362 = vadd.xlane.f32.xlu1 %v361_v44 }
 0x309   :  { %v371_v47 = vsel %vm360_vm5, %v369_v46, 0.0 }
 0x30a   :  { %375 = vadd.xlane.f32.xlu0 %v374_v45 }
 0x30e   :  { %372 = vadd.xlane.f32.xlu0 %v371_v47  ;;  %v448_v47 = vld [vmem:[#allocation2 + $0x38] sm:$0xff] }
 0x38f   :  { %v366_v49 = vpop.xlane.xlu0 %365 }
 0x390   :  { %v368_v50 = vmul.f32 0.03125, %v366_v49 }
 0x391   :  { %v363_v51 = vpop.xlane.xlu1 %362 }
 0x392   :  { %v380_v53 = vmul.f32 %v368_v50, %v368_v50  ;;  %v367_v54 = vmul.f32 0.03125, %v363_v51 }
 0x393   :  { %v376_v52 = vpop.xlane.xlu0 %375 }
 0x394   :  { %v378_v55 = vmul.f32 0.03125, %v376_v52  ;;  %v379_v58 = vmul.f32 %v367_v54, %v367_v54 }
 0x396   :  { %v382_v56 = vsub.f32 %v378_v55, %v380_v53 }
 0x397   :  { %v373_v57 = vpop.xlane.xlu0 %372 }
 0x398   :  { %v384_v59 = vadd.f32 1e-05, %v382_v56  ;;  %v377_v60 = vmul.f32 0.03125, %v373_v57 }
 0x39a   :  { %2486 = vrsqrt.f32 %v384_v59  ;;  %v381_v61 = vsub.f32 %v377_v60, %v379_v58 }
 0x39c   :  { %v383_v62 = vadd.f32 1e-05, %v381_v61 }
 0x39e   :  { %2488 = vrsqrt.f32 %v383_v62 }
 0x3a7   :  { %v2487_v1 = vpop.eup %2486 }
 0x3a8   :  { %v388_v2 = vmul.f32 %v2487_v1, %v2586_v0  ;;  %v449_v1 = vld [vmem:[#allocation2 + $0x40] sm:$0xff] }
 0x3a9   :  { %2272 = vmatprep.mubr.msk.f32.mxu1 %vm492_vm9, %v449_v1  ;;  %v924_v1 = vld [vmem:[#allocation2 + $0x160] sm:$0xff] }
 0x3aa   :  { %v390_v4 = vmul.f32 %v388_v2, %v368_v50 }
 0x3ab   :  { %v2489_v5 = vpop.eup %2488 }
 0x3ac   :  { %395 = vrot.lane.b32.xlu1 %v390_v4, %s2530_s18  ;;  %v387_v6 = vmul.f32 %v2489_v5, %v2589_v3  ;;  %v2534_v5 = vmov 3  }
 0x3ae   :  { %v389_v7 = vmul.f32 %v387_v6, %v367_v54 }
 0x3b0   :  { %408 = vperm.xlu1 %2457, %v388_v2   ;;  %393 = vrot.lane.b32.xlu0 %v389_v7, %s2530_s18 }
 0x3b4   :  { %403 = vperm.xlu1 %2457, %v387_v6  }
 0x3b8   :  { %2459 = vset.pattern.permute.xlu1 %v2529_v63 }
 0x41e   :  { %v396_v8 = vpop.permute.xlu1 %395 }
 0x41f   :  { %v400_v9 = vsub.f32 %v2586_v0, %v396_v8 }
 0x421   :  { %420 = vperm.xlu0 %2458, %v400_v9  }
 0x422   :  { %v394_v10 = vpop.permute.xlu0 %393 }
 0x423   :  { %v399_v11 = vsub.f32 %v2589_v3, %v394_v10 }
 0x425   :  { %415 = vperm.xlu1 %2459, %v399_v11   ;;  %2461 = vset.pattern.permute.xlu0 %v2533_v35 }
 0x429   :  { %2460 = vset.pattern.permute.xlu1 %v2533_v35 }
 0x42b   :  { %v409_v12 = vpop.permute.xlu1 %408 }
 0x42c   :  { %v412_v13 = vmul.f32 %v409_v12, %v355_v39  ;;  %v450_v12 = vld [vmem:[#allocation2 + $0x48] sm:$0xff] }
 0x42f   :  { %v404_v14 = vpop.permute.xlu1 %403 }
 0x430   :  { %v411_v17 = vmul.f32 %v404_v14, %v350_v41 }
 0x49c   :  { %v421_v15 = vpop.permute.xlu0 %420 }
 0x49d   :  { %v424_v16 = vadd.f32 %v421_v15, %v412_v13  ;;  %v699_v13 = vld [vmem:[#allocation2 + $0x80] sm:$0xff] }
 0x49f   :  { %vm426_vm6 = vcmp.gt.f32.partialorder %v424_v16, 0.0  ;;  %v428_v18 = vmul.f32 0.01, %v424_v16 }
 0x4a0   :  { %v416_v19 = vpop.permute.xlu1 %415 }
 0x4a1   :  { %v2597_v20 = vsel %vm426_vm6, %v424_v16, %v428_v18  ;;  %v423_v21 = vadd.f32 %v416_v19, %v411_v17  ;;  %vm2538_vm6 = vmmov 0  }
 0x4a2   :  { %455 = vrot.lane.b32.xlu1 %v2597_v20, %s2531_s19 }
 0x4a3   :  { %vm425_vm7 = vcmp.gt.f32.partialorder %v423_v21, 0.0  ;;  %v427_v22 = vmul.f32 0.01, %v423_v21 }
 0x4a5   :  { %v2601_v23 = vsel %vm425_vm7, %v423_v21, %v427_v22 }
 0x4a6   :  { %452 = vrot.lane.b32.xlu0 %v2601_v23, %s2531_s19 }
 0x514   :  { %v456_v24 = vpop.permute.xlu1 %455 }
 0x515   :  { %v457_v26 = vsel %vm451_vm8, %v456_v24, %v2597_v20 }
 0x516   :  { %460 = vrot.lane.b32.xlu1 %v457_v26, %s2531_s19 }
 0x518   :  { %v453_v28 = vpop.permute.xlu0 %452 }
 0x519   :  { %v454_v29 = vsel %vm451_vm8, %v453_v28, %v2601_v23  ;;  %v700_v28 = vld [vmem:[#allocation2 + $0x88] sm:$0xff] }
 0x51a   :  { %458 = vrot.lane.b32.xlu0 %v454_v29, %s2531_s19  ;;  %v701_v29 = vld [vmem:[#allocation2 + $0x90] sm:$0xff] }
 0x588   :  { %v461_v30 = vpop.permute.xlu1 %460 }
 0x589   :  { %v463_v31 = vsel %vm451_vm8, %v461_v30, %v2597_v20  ;;  %v702_v30 = vld [vmem:[#allocation2 + $0x98] sm:$0xff] }
 0x58a   :  { %476 = vrot.lane.b32.xlu1 %v463_v31, %s2526_s1 }
 0x58c   :  { %v459_v33 = vpop.permute.xlu0 %458 }
 0x58d   :  { %v462_v34 = vsel %vm451_vm8, %v459_v33, %v2601_v23  ;;  %v707_v33 = vld [vmem:[#allocation2 + $0xc0] sm:$0xff] }
 0x58e   :  { %474 = vrot.lane.b32.xlu0 %v462_v34, %s2526_s1  ;;  %468 = vrot.lane.b32.xlu1 %v463_v31, %s2532_s20  ;;  %v703_v31 = vld [vmem:[#allocation2 + $0xa0] sm:$0xff] }
 0x592   :  { %466 = vrot.lane.b32.xlu0 %v462_v34, %s2532_s20  ;;  %489 = vperm.xlu1 %2460, %v2586_v0   ;;  %v708_v34 = vld [vmem:[#allocation2 + $0xc8] sm:$0xff] }
 0x596   :  { %484 = vperm.xlu0 %2461, %v2589_v3   ;;  %2463 = vset.pattern.permute.xlu1 %v2534_v5 }
 0x59a   :  { %2462 = vset.pattern.permute.xlu0 %v2534_v5 }
 0x5fc   :  { %v477_v38 = vpop.permute.xlu1 %476 }
 0x5fd   :  { %v481_v39 = vmul.f32 %v477_v38, %v2626_v37  ;;  %v710_v38 = vld [vmem:[#allocation2 + $0xd8] sm:$0xff] }
 0x5ff   :  { %2245 = vmatprep.subr.mxu0 %v481_v39 }
 0x600   :  { %v475_v40 = vpop.permute.xlu0 %474  ;;  %2246 = vmatpush3.msra.mxu0 %v481_v39  ;;  %v469_v43 = vpop.permute.xlu1 %468 }
 0x601   :  { %v480_v41 = vmul.f32 %v475_v40, %v2626_v37  ;;  %v473_v45 = vmul.f32 %v469_v43, %v2631_v42 }
 0x603   :  { %2247 = vmatprep.subr.mxu0 %v480_v41 }
 0x604   :  { %2248 = vmatpush3.msra.mxu0 %v480_v41  ;;  %v467_v44 = vpop.permute.xlu0 %466 }
 0x605   :  { %2249 = vmatprep.subr.mxu0 %v2597_v20  ;;  %v472_v46 = vmul.f32 %v467_v44, %v2631_v42 }
 0x606   :  { %2250 = vmatpush3.msra.mxu0 %v2597_v20 }
 0x607   :  { %2251 = vmatprep.subr.mxu0 %v2601_v23 }
 0x608   :  { %2252 = vmatpush3.msra.mxu0 %v2601_v23 }
 0x609   :  { %2253 = vmatprep.subr.mxu0 %v473_v45 }
 0x60a   :  { %2254 = vmatpush3.msra.mxu0 %v473_v45 }
 0x60b   :  { %2255 = vmatprep.subr.mxu0 %v472_v46 }
 0x60c   :  { %2256 = vmatpush3.msra.mxu0 %v472_v46 }
 0x60d   :  { %2258 = vmatmul.mubr.msk.f32.vlgmr.msra.gmra.mxu0 %vm492_vm9, %v448_v47  ;;  %v490_v49 = vpop.permute.xlu1 %489 }
 0x60e   :  { %2279 = vmatprep.mubr.msk.f32.mxu0 %vm195_vm4, %v699_v13 }
 0x611   :  { %v485_v51 = vpop.permute.xlu0 %484 }
 0x6cd   :  { %v2259_v50 = vpop.f32.mrf.mxu0 }
 0x6ce   :  { %v571_v52 = vadd.f32 %v2259_v50, %v490_v49 }
 0x6cf   :  { %v565_v53 = vpop.f32.mrf.mxu0 }
 0x6d0   :  { %v575_v54 = vmax.f32 %v571_v52, 0.0  ;;  %v566_v55 = vadd.f32 %v565_v53, %v485_v51  ;;  %v927_v52 = vld [vmem:[#allocation2 + $0x178] sm:$0xff] }
 0x6d2   :  { %579 = vrot.lane.b32.xlu1 %v575_v54, %s2531_s19  ;;  %v574_v56 = vmax.f32 %v566_v55, 0.0 }
 0x6d6   :  { %576 = vrot.lane.b32.xlu1 %v574_v56, %s2531_s19 }
 0x744   :  { %v580_v57 = vpop.permute.xlu1 %579 }
 0x745   :  { %v581_v58 = vsel %vm451_vm8, %v580_v57, %v575_v54 }
 0x746   :  { %584 = vrot.lane.b32.xlu0 %v581_v58, %s2531_s19 }
 0x748   :  { %v577_v59 = vpop.permute.xlu1 %576 }
 0x749   :  { %v578_v60 = vsel %vm451_vm8, %v577_v59, %v574_v56 }
 0x74a   :  { %582 = vrot.lane.b32.xlu1 %v578_v60, %s2531_s19 }
 0x7b8   :  { %v585_v61 = vpop.permute.xlu0 %584 }
 0x7b9   :  { %v587_v62 = vsel %vm451_vm8, %v585_v61, %v575_v54  ;;  %v926_v61 = vld [vmem:[#allocation2 + $0x170] sm:$0xff] }
 0x7ba   :  { %600 = vrot.lane.b32.xlu0 %v587_v62, %s2526_s1 }
 0x7bc   :  { %v583_v2 = vpop.permute.xlu1 %582 }
 0x7bd   :  { %v586_v4 = vsel %vm451_vm8, %v583_v2, %v574_v56  ;;  %v923_v2 = vld [vmem:[#allocation2 + $0x158] sm:$0xff] }
 0x7be   :  { %592 = vrot.lane.b32.xlu0 %v587_v62, %s2532_s20  ;;  %598 = vrot.lane.b32.xlu1 %v586_v4, %s2526_s1  ;;  %v925_v62 = vld [vmem:[#allocation2 + $0x168] sm:$0xff] }
 0x7c2   :  { %590 = vrot.lane.b32.xlu1 %v586_v4, %s2532_s20  ;;  %611 = vperm.xlu0 %2462, %v2586_v0  }
 0x7c6   :  { %607 = vperm.xlu1 %2463, %v2589_v3   ;;  %2465 = vset.pattern.permute.xlu0 %v2528_v48 }
 0x7ca   :  { %2464 = vset.pattern.permute.xlu1 %v2528_v48 }
 0x82c   :  { %v601_v6 = vpop.permute.xlu0 %600 }
 0x82d   :  { %v605_v7 = vmul.f32 %v601_v6, %v2626_v37 }
 0x82f   :  { %2260 = vmatprep.subr.mxu1 %v605_v7 }
 0x830   :  { %2261 = vmatpush3.msra.mxu1 %v605_v7  ;;  %v599_v8 = vpop.permute.xlu1 %598  ;;  %v593_v10 = vpop.permute.xlu0 %592 }
 0x831   :  { %v604_v9 = vmul.f32 %v599_v8, %v2626_v37  ;;  %v597_v0 = vmul.f32 %v593_v10, %v2631_v42 }
 0x833   :  { %2262 = vmatprep.subr.mxu1 %v604_v9 }
 0x834   :  { %2263 = vmatpush3.msra.mxu1 %v604_v9  ;;  %v591_v11 = vpop.permute.xlu1 %590 }
 0x835   :  { %2264 = vmatprep.subr.mxu1 %v575_v54  ;;  %v596_v3 = vmul.f32 %v591_v11, %v2631_v42 }
 0x836   :  { %2265 = vmatpush3.msra.mxu1 %v575_v54 }
 0x837   :  { %2266 = vmatprep.subr.mxu1 %v574_v56 }
 0x838   :  { %2267 = vmatpush3.msra.mxu1 %v574_v56 }
 0x839   :  { %2268 = vmatprep.subr.mxu1 %v597_v0 }
 0x83a   :  { %2269 = vmatpush3.msra.mxu1 %v597_v0 }
 0x83b   :  { %2270 = vmatprep.subr.mxu1 %v596_v3 }
 0x83c   :  { %2271 = vmatpush3.msra.mxu1 %v596_v3 }
 0x83d   :  { %2273 = vmatmul.mubr.msk.f32.vlgmr.msra.gmra.mxu1 %vm492_vm9, %v450_v12  ;;  %v612_v14 = vpop.permute.xlu0 %611  ;;  %2297 = vmatprep.subr.mxu1 %v927_v52 }
 0x83e   :  { %2298 = vmatpush3.msra.mxu1 %v927_v52 }
 0x83f   :  { %2299 = vmatprep.subr.mxu1 %v926_v61 }
 0x840   :  { %2300 = vmatpush3.msra.mxu1 %v926_v61 }
 0x841   :  { %v608_v16 = vpop.permute.xlu1 %607  ;;  %2301 = vmatprep.subr.mxu1 %v925_v62 }
 0x842   :  { %2302 = vmatpush3.msra.mxu1 %v925_v62 }
 0x843   :  { %2303 = vmatprep.subr.mxu1 %v924_v1 }
 0x844   :  { %2304 = vmatpush3.msra.mxu1 %v924_v1 }
 0x845   :  { %2311 = vmatprep.subr.mxu1 %v923_v2 }
 0x8fd   :  { %v2274_v15 = vpop.f32.mrf.mxu1 }
 0x8fe   :  { %v692_v17 = vadd.f32 %v2274_v15, %v612_v14 }
 0x8ff   :  { %v686_v18 = vpop.f32.mrf.mxu1 }
 0x900   :  { %v696_v19 = vadd.f32 %v692_v17, %v2597_v20  ;;  %v687_v21 = vadd.f32 %v686_v18, %v608_v16  ;;  %v704_v20 = vld [vmem:[#allocation2 + $0xa8] sm:$0xff] }
 0x902   :  { %v698_v22 = vmax.f32 %v696_v19, 0.0  ;;  %v695_v24 = vadd.f32 %v687_v21, %v2601_v23  ;;  %v706_v23 = vld [vmem:[#allocation2 + $0xb8] sm:$0xff] }
 0x904   :  { %2275 = vmatprep.subr.mxu0 %v698_v22  ;;  %v697_v26 = vmax.f32 %v695_v24, 0.0 }
 0x905   :  { %2276 = vmatpush3.msra.mxu0 %v698_v22  ;;  %v922_v22 = vld [vmem:[#allocation2 + $0x150] sm:$0xff] }
 0x906   :  { %2277 = vmatprep.subr.mxu0 %v697_v26 }
 0x907   :  { %2278 = vmatpush3.msra.mxu0 %v697_v26  ;;  %v921_v26 = vld [vmem:[#allocation2 + $0x148] sm:$0xff] }
 0x908   :  { %2280 = vmatmul.mubr.msk.f32.vlgmr.msra.gmra.mxu0 %vm195_vm4, %v700_v28 }
 0x909   :  { %2282 = vmatprep.mubr.msk.f32.mxu0 %vm195_vm4, %v701_v29  ;;  %v920_v29 = vld [vmem:[#allocation2 + $0x140] sm:$0xff] }
 0x90c   :  { %2283 = vmatmul.mubr.msk.f32.gmra.mxu0 %vm195_vm4, %v702_v30 }
 0x90d   :  { %2285 = vmatprep.mubr.msk.f32.mxu0 %vm195_vm4, %v703_v31 }
 0x910   :  { %2286 = vmatmul.mubr.msk.f32.gmra.mxu0 %vm195_vm4, %v704_v20 }
 0x911   :  { %2288 = vmatprep.mubr.msk.f32.mxu0 %vm195_vm4, %v705_v32 }
 0x914   :  { %2289 = vmatmul.mubr.msk.f32.gmra.mxu0 %vm195_vm4, %v706_v23 }
 0x915   :  { %2291 = vmatprep.mubr.msk.f32.mxu0 %vm195_vm4, %v707_v33 }
 0x918   :  { %2292 = vmatmul.mubr.msk.f32.gmra.mxu0 %vm195_vm4, %v708_v34 }
 0x919   :  { %2294 = vmatprep.mubr.msk.f32.mxu0 %vm195_vm4, %v709_v36 }
 0x91c   :  { %2295 = vmatmul.mubr.msk.f32.gmra.mxu0 %vm195_vm4, %v710_v38 }
 0x9c8   :  { %v2678_v39 = vpop.f32.mrf.mxu0 }
 0x9ca   :  { %v2680_v40 = vpop.f32.mrf.mxu0 }
 0x9cc   :  { %v2682_v41 = vpop.f32.mrf.mxu0 }
 0x9ce   :  { %v2684_v42 = vpop.f32.mrf.mxu0 }
 0x9d0   :  { %v2287_v43 = vpop.f32.mrf.mxu0 }
 0x9d2   :  { %v833_v44 = vpop.f32.mrf.mxu0 }
 0x9d4   :  { %v2686_v45 = vpop.f32.mrf.mxu0 }
 0x9d6   :  { %v843_v46 = vpop.f32.mrf.mxu0 }
 0x9d8   :  { %v2293_v47 = vpop.f32.mrf.mxu0 }
 0x9d9   :  { %875 = vrot.lane.b32.xlu0 %v2293_v47, %s2531_s19 }
 0x9da   :  { %v853_v49 = vpop.f32.mrf.mxu0 }
 0x9db   :  { %872 = vrot.lane.b32.xlu1 %v853_v49, %s2531_s19 }
 0x9dc   :  { %v2296_v50 = vpop.f32.mrf.mxu0 }
 0x9dd   :  { %881 = vrot.lane.b32.xlu0 %v2296_v50, %s2531_s19 }
 0x9de   :  { %v863_v51 = vpop.f32.mrf.mxu0 }
 0x9df   :  { %878 = vrot.lane.b32.xlu1 %v863_v51, %s2531_s19 }
 0xa4b   :  { %v876_v53 = vpop.permute.xlu0 %875 }
 0xa4c   :  { %v877_v54 = vsel %vm451_vm8, %v876_v53, %v2293_v47 }
 0xa4d   :  { %v873_v55 = vpop.permute.xlu1 %872  ;;  %886 = vrot.lane.b32.xlu0 %v877_v54, %s2531_s19 }
 0xa4e   :  { %v874_v56 = vsel %vm451_vm8, %v873_v55, %v853_v49 }
 0xa4f   :  { %v882_v57 = vpop.permute.xlu0 %881  ;;  %884 = vrot.lane.b32.xlu1 %v874_v56, %s2531_s19 }
 0xa50   :  { %v883_v58 = vsel %vm451_vm8, %v882_v57, %v2296_v50 }
 0xa51   :  { %890 = vrot.lane.b32.xlu0 %v883_v58, %s2531_s19  ;;  %v879_v59 = vpop.permute.xlu1 %878 }
 0xa52   :  { %v880_v60 = vsel %vm451_vm8, %v879_v59, %v863_v51 }
 0xa53   :  { %888 = vrot.lane.b32.xlu1 %v880_v60, %s2531_s19 }
 0xabf   :  { %v887_v4 = vpop.permute.xlu0 %886 }
 0xac0   :  { %v893_v6 = vsel %vm451_vm8, %v887_v4, %v2293_v47 }
 0xac1   :  { %902 = vrot.lane.b32.xlu0 %v893_v6, %s2526_s1  ;;  %v885_v7 = vpop.permute.xlu1 %884 }
 0xac2   :  { %v892_v8 = vsel %vm451_vm8, %v885_v7, %v853_v49 }
 0xac3   :  { %v891_v9 = vpop.permute.xlu0 %890  ;;  %900 = vrot.lane.b32.xlu1 %v892_v8, %s2526_s1 }
 0xac4   :  { %v895_v10 = vsel %vm451_vm8, %v891_v9, %v2296_v50 }
 0xac5   :  { %906 = vrot.lane.b32.xlu0 %v895_v10, %s2526_s1  ;;  %v889_v11 = vpop.permute.xlu1 %888 }
 0xac6   :  { %v894_v0 = vsel %vm451_vm8, %v889_v11, %v863_v51 }
 0xac7   :  { %904 = vrot.lane.b32.xlu1 %v894_v0, %s2526_s1 }
 0xb33   :  { %v903_v3 = vpop.permute.xlu0 %902 }
 0xb34   :  { %v913_v12 = vmul.f32 %v903_v3, %v2626_v37 }
 0xb35   :  { %v901_v13 = vpop.permute.xlu1 %900 }
 0xb36   :  { %v912_v14 = vmul.f32 %v901_v13, %v2626_v37  ;;  %v917_v17 = vadd.f32 %v2287_v43, %v913_v12 }
 0xb37   :  { %v907_v15 = vpop.permute.xlu0 %906 }
 0xb38   :  { %v916_v16 = vadd.f32 %v912_v14, %v833_v44  ;;  %v915_v18 = vmul.f32 %v907_v15, %v2626_v37 }
 0xb39   :  { %v905_v19 = vpop.permute.xlu1 %904 }
 0xb3a   :  { %v914_v21 = vmul.f32 %v905_v19, %v2626_v37  ;;  %2305 = vmatprep.mubr.msk.f32.mxu1 %vm360_vm5, %v916_v16  ;;  %v919_v28 = vadd.f32 %v2686_v45, %v915_v18 }
 0xb3b   :  { %2306 = vmatmul.mubr.msk.f32.vlgmr.msra.gmra.mxu1 %vm360_vm5, %v917_v17 }
 0xb3c   :  { %v918_v24 = vadd.f32 %v914_v21, %v843_v46  ;;  %2312 = vmatpush3.msra.mxu1 %v923_v2  ;;  %v2753_v21 = vld [vmem:[#allocation2 + $0x138] sm:$0xff] }
 0xb3d   :  { %2313 = vmatprep.subr.mxu1 %v922_v22 }
 0xb3e   :  { %2308 = vmatprep.mubr.msk.f32.mxu1 %vm360_vm5, %v918_v24  ;;  %2314 = vmatpush3.msra.mxu1 %v922_v22  ;;  %v2755_v24 = vld [vmem:[#allocation2 + $0x120] sm:$0xff] }
 0xb3f   :  { %2309 = vmatmul.mubr.msk.f32.gmra.mxu1 %vm360_vm5, %v919_v28  ;;  %2315 = vmatprep.subr.mxu1 %v921_v26 }
 0xb40   :  { %2316 = vmatpush3.msra.mxu1 %v921_v26  ;;  %2319 = vmatprep.mubr.msk.f32.mxu1 %vm360_vm5, %v2680_v40 }
 0xb41   :  { %2317 = vmatprep.subr.mxu1 %v920_v29 }
 0xb42   :  { %2318 = vmatpush3.msra.mxu1 %v920_v29  ;;  %v2758_v29 = vld [vmem:[#allocation2 + $0x130] sm:$0xff] }
 0xb43   :  { %2320 = vmatmul.mubr.msk.f32.vlgmr.msra.gmra.mxu1 %vm360_vm5, %v2678_v39 }
 0xb44   :  { %2322 = vmatprep.mubr.msk.f32.mxu1 %vm360_vm5, %v2684_v42 }
 0xb47   :  { %2323 = vmatmul.mubr.msk.f32.gmra.mxu1 %vm360_vm5, %v2682_v41 }
 0xbfb   :  { %v2307_v37 = vpop.f32.mrf.mxu1 }
 0xbfd   :  { %v1006_v30 = vpop.f32.mrf.mxu1 }
 0xbff   :  { %v2310_v31 = vpop.f32.mrf.mxu1 }
 0xc01   :  { %v1016_v20 = vpop.f32.mrf.mxu1 }
 0xc03   :  { %v2321_v32 = vpop.f32.mrf.mxu1 }
 0xc04   :  { %v2725_v23 = vadd.f32 %v2321_v32, %v2307_v37  ;;  %v2763_v32 = vld [vmem:[#allocation2 + $0x128] sm:$0xff] }
 0xc05   :  { %v1103_v33 = vpop.f32.mrf.mxu1 }
 0xc06   :  { %v1130_v34 = vsel %vm1126_vm12, %v2725_v23, 0.0  ;;  %v2731_v40 = vadd.f32 %v1103_v33, %v1006_v30  ;;  %v1144_v52 = vmul.f32 %v2725_v23, %v2725_v23 }
 0xc07   :  { %1131 = vadd.xlane.f32.xlu1 %v1130_v34  ;;  %v2324_v36 = vpop.f32.mrf.mxu1 }
 0xc08   :  { %v2729_v38 = vadd.f32 %v2324_v36, %v2310_v31  ;;  %v1127_v45 = vsel %vm1126_vm12, %v2731_v40, 0.0  ;;  %v1143_v46 = vmul.f32 %v2731_v40, %v2731_v40  ;;  %v1150_v53 = vsel %vm1126_vm12, %v1144_v52, 0.0 }
 0xc09   :  { %v1113_v39 = vpop.f32.mrf.mxu1 }
 0xc0a   :  { %v2733_v41 = vadd.f32 %v1113_v39, %v1016_v20  ;;  %v1136_v42 = vsel %vm1126_vm12, %v2729_v38, 0.0  ;;  %v1146_v44 = vmul.f32 %v2729_v38, %v2729_v38  ;;  %v1147_v50 = vsel %vm1126_vm12, %v1143_v46, 0.0 }
 0xc0b   :  { %1137 = vadd.xlane.f32.xlu1 %v1136_v42 }
 0xc0c   :  { %v1133_v43 = vsel %vm1126_vm12, %v2733_v41, 0.0  ;;  %v1156_v47 = vsel %vm1126_vm12, %v1146_v44, 0.0  ;;  %v1145_v49 = vmul.f32 %v2733_v41, %v2733_v41 }
 0xc0d   :  { %1134 = vadd.xlane.f32.xlu0 %v1133_v43 }
 0xc0e   :  { %v1153_v51 = vsel %vm1126_vm12, %v1145_v49, 0.0 }
 0xc0f   :  { %1128 = vadd.xlane.f32.xlu1 %v1127_v45 }
 0xc11   :  { %1157 = vadd.xlane.f32.xlu0 %v1156_v47 }
 0xc13   :  { %1148 = vadd.xlane.f32.xlu1 %v1147_v50 }
 0xc15   :  { %1154 = vadd.xlane.f32.xlu0 %v1153_v51 }
 0xc19   :  { %1151 = vadd.xlane.f32.xlu0 %v1150_v53 }
 0xc90   :  { %v1132_v54 = vpop.xlane.xlu1 %1131 }
 0xc91   :  { %v1140_v8 = vmul.f32 0.015625, %v1132_v54 }
 0xc93   :  { %v1164_v15 = vmul.f32 %v1140_v8, %v1140_v8 }
 0xc94   :  { %v1138_v55 = vpop.xlane.xlu1 %1137 }
 0xc95   :  { %v1142_v57 = vmul.f32 0.015625, %v1138_v55 }
 0xc96   :  { %v1135_v56 = vpop.xlane.xlu0 %1134 }
 0xc97   :  { %v1166_v61 = vmul.f32 %v1142_v57, %v1142_v57  ;;  %v1141_v62 = vmul.f32 0.015625, %v1135_v56 }
 0xc98   :  { %v1129_v58 = vpop.xlane.xlu1 %1128 }
 0xc99   :  { %v1139_v59 = vmul.f32 0.015625, %v1129_v58  ;;  %v1165_v10 = vmul.f32 %v1141_v62, %v1141_v62 }
 0xc9a   :  { %v1158_v60 = vpop.xlane.xlu0 %1157 }
 0xc9b   :  { %v1162_v1 = vmul.f32 0.015625, %v1158_v60  ;;  %v1163_v4 = vmul.f32 %v1139_v59, %v1139_v59 }
 0xc9c   :  { %v1149_v2 = vpop.xlane.xlu1 %1148 }
 0xc9d   :  { %v1170_v6 = vsub.f32 %v1162_v1, %v1166_v61  ;;  %v1159_v7 = vmul.f32 0.015625, %v1149_v2 }
 0xc9e   :  { %v1155_v9 = vpop.xlane.xlu0 %1154 }
 0xc9f   :  { %v1174_v11 = vadd.f32 1e-05, %v1170_v6  ;;  %v1167_v0 = vsub.f32 %v1159_v7, %v1163_v4  ;;  %v1161_v3 = vmul.f32 0.015625, %v1155_v9 }
 0xca1   :  { %2490 = vrsqrt.f32 %v1174_v11  ;;  %v1171_v12 = vadd.f32 1e-05, %v1167_v0  ;;  %v1169_v13 = vsub.f32 %v1161_v3, %v1165_v10 }
 0xca2   :  { %v1152_v14 = vpop.xlane.xlu0 %1151 }
 0xca3   :  { %2492 = vrsqrt.f32 %v1171_v12  ;;  %v1173_v16 = vadd.f32 1e-05, %v1169_v13  ;;  %v1160_v17 = vmul.f32 0.015625, %v1152_v14 }
 0xca5   :  { %2494 = vrsqrt.f32 %v1173_v16  ;;  %v1168_v18 = vsub.f32 %v1160_v17, %v1164_v15 }
 0xca7   :  { %v1172_v19 = vadd.f32 1e-05, %v1168_v18 }
 0xca9   :  { %2496 = vrsqrt.f32 %v1172_v19 }
 0xcae   :  { %v2491_v22 = vpop.eup %2490 }
 0xcaf   :  { %v1182_v26 = vmul.f32 %v2491_v22, %v2753_v21 }
 0xcb0   :  { %v2493_v28 = vpop.eup %2492 }
 0xcb1   :  { %v1186_v37 = vmul.f32 %v1182_v26, %v1142_v57  ;;  %v1179_v30 = vmul.f32 %v2493_v28, %v2755_v24 }
 0xcb2   :  { %v2495_v31 = vpop.eup %2494 }
 0xcb3   :  { %1197 = vrot.lane.b32.xlu0 %v1186_v37, %s2530_s18  ;;  %v1181_v20 = vmul.f32 %v2495_v31, %v2758_v29  ;;  %v1183_v34 = vmul.f32 %v1179_v30, %v1139_v59 }
 0xcb5   :  { %v1185_v33 = vmul.f32 %v1181_v20, %v1141_v62 }
 0xcb6   :  { %v2497_v36 = vpop.eup %2496 }
 0xcb7   :  { %1195 = vrot.lane.b32.xlu1 %v1185_v33, %s2530_s18  ;;  %1191 = vrot.lane.b32.xlu0 %v1183_v34, %s2530_s18  ;;  %v1180_v39 = vmul.f32 %v2497_v36, %v2763_v32  ;;  %v1271_v33 = vand.u32 31, %v2572_v25 }
 0xcb9   :  { %v1184_v42 = vmul.f32 %v1180_v39, %v1140_v8  ;;  %vm1281_vm3 = vcmp.eq.s32.totalorder %v1271_v33, 31  ;;  %vm1279_vm4 = vcmp.eq.s32.totalorder %v1271_v33, 0 }
 0xcba   :  { %v2834_v34 = vsel %vm1281_vm3, 0.0, %v2527_v27 }
 0xcbb   :  { %1193 = vrot.lane.b32.xlu1 %v1184_v42, %s2530_s18  ;;  %1219 = vperm.xlu0 %2465, %v1181_v20   ;;  %v1283_v20 = vld [vmem:[#allocation2 + $0xe0] sm:$0xff] }
 0xcbc   :  { %2349 = vmatprep.mubr.msk.f32.mxu0 %vm1372_vm2, %v1283_v20 }
 0xcbf   :  { %1224 = vperm.xlu1 %2464, %v1182_v26   ;;  %2467 = vset.pattern.permute.xlu0 %v2529_v63 }
 0xcc3   :  { %1214 = vperm.xlu1 %2464, %v1180_v39  }
 0xcc7   :  { %1209 = vperm.xlu1 %2464, %v1179_v30  }
 0xccb   :  { %2466 = vset.pattern.permute.xlu1 %v2529_v63 }
 0xd25   :  { %v1198_v43 = vpop.permute.xlu0 %1197 }
 0xd26   :  { %v1206_v44 = vsub.f32 %v2753_v21, %v1198_v43 }
 0xd28   :  { %1248 = vperm.xlu1 %2466, %v1206_v44  }
 0xd29   :  { %v1196_v45 = vpop.permute.xlu1 %1195  ;;  %v1192_v47 = vpop.permute.xlu0 %1191 }
 0xd2a   :  { %v1205_v46 = vsub.f32 %v2758_v29, %v1196_v45  ;;  %v1203_v50 = vsub.f32 %v2755_v24, %v1192_v47 }
 0xd2c   :  { %1243 = vperm.xlu0 %2467, %v1205_v46  }
 0xd2d   :  { %v1194_v49 = vpop.permute.xlu1 %1193 }
 0xd2e   :  { %v1204_v51 = vsub.f32 %v2763_v32, %v1194_v49 }
 0xd30   :  { %1233 = vperm.xlu0 %2467, %v1203_v50   ;;  %1238 = vperm.xlu1 %2466, %v1204_v51   ;;  %v2844_v50 = vsel %vm1279_vm4, 0.0, %v2527_v27 }
 0xd34   :  { %2468 = vset.pattern.permute.xlu1 %v2533_v35  ;;  %2469 = vset.pattern.permute.xlu0 %v2533_v35 }
 0xd36   :  { %v1220_v56 = vpop.permute.xlu0 %1219 }
 0xd37   :  { %v1229_v59 = vmul.f32 %v1220_v56, %v2733_v41 }
 0xd3a   :  { %v1225_v52 = vpop.permute.xlu1 %1224 }
 0xd3b   :  { %v1230_v55 = vmul.f32 %v1225_v52, %v2729_v38 }
 0xd3e   :  { %v1215_v53 = vpop.permute.xlu1 %1214 }
 0xd3f   :  { %v1228_v2 = vmul.f32 %v1215_v53, %v2725_v23 }
 0xd42   :  { %v1210_v54 = vpop.permute.xlu1 %1209 }
 0xd43   :  { %v1227_v4 = vmul.f32 %v1210_v54, %v2731_v40 }
 0xda3   :  { %v1249_v57 = vpop.permute.xlu1 %1248 }
 0xda4   :  { %v1254_v58 = vadd.f32 %v1249_v57, %v1230_v55 }
 0xda6   :  { %vm1258_vm13 = vcmp.gt.f32.partialorder %v1254_v58, 0.0  ;;  %v1262_v60 = vmul.f32 0.01, %v1254_v58 }
 0xda7   :  { %v1244_v61 = vpop.permute.xlu0 %1243 }
 0xda8   :  { %v2779_v62 = vsel %vm1258_vm13, %v1254_v58, %v1262_v60  ;;  %v1253_v1 = vadd.f32 %v1244_v61, %v1229_v59  ;;  %v1284_v58 = vld [vmem:[#allocation2 + $0xe8] sm:$0xff]  ;;  %v1285_v59 = vld [vmem:[#allocation2 + $0xf0] sm:$0xff]  ;;  %v1286_v60 = vld [vmem:[#allocation2 + $0xf8] sm:$0xff] }
 0xda9   :  { %1301 = vrot.lane.b32.xlu1 %v2779_v62, %s2535_s21 }
 0xdaa   :  { %vm1257_vm14 = vcmp.gt.f32.partialorder %v1253_v1, 0.0  ;;  %v1261_v38 = vmul.f32 0.01, %v1253_v1 }
 0xdab   :  { %v1234_v6 = vpop.permute.xlu0 %1233  ;;  %v1239_v7 = vpop.permute.xlu1 %1238 }
 0xdac   :  { %v2785_v8 = vsel %vm1257_vm14, %v1253_v1, %v1261_v38  ;;  %v1251_v41 = vadd.f32 %v1234_v6, %v1227_v4  ;;  %v1252_v9 = vadd.f32 %v1239_v7, %v1228_v2 }
 0xdad   :  { %1298 = vrot.lane.b32.xlu0 %v2785_v8, %s2535_s21 }
 0xdae   :  { %vm1255_vm15 = vcmp.gt.f32.partialorder %v1251_v41, 0.0  ;;  %v1259_v10 = vmul.f32 0.01, %v1251_v41  ;;  %vm1256_vm0 = vcmp.gt.f32.partialorder %v1252_v9, 0.0  ;;  %v1260_v11 = vmul.f32 0.01, %v1252_v9 }
 0xdb0   :  { %v2789_v0 = vsel %vm1255_vm15, %v1251_v41, %v1259_v10  ;;  %v2791_v23 = vsel %vm1256_vm0, %v1252_v9, %v1260_v11 }
 0xdb1   :  { %1292 = vrot.lane.b32.xlu0 %v2789_v0, %s2535_s21  ;;  %1295 = vrot.lane.b32.xlu1 %v2791_v23, %s2535_s21 }
 0xe1b   :  { %v1302_v40 = vpop.permute.xlu1 %1301 }
 0xe1c   :  { %v1303_v3 = vsel %vm1291_vm1, %v1302_v40, %v2779_v62 }
 0xe1d   :  { %1310 = vrot.lane.b32.xlu1 %v1303_v3, %s2535_s21 }
 0xe1f   :  { %v1299_v12 = vpop.permute.xlu0 %1298 }
 0xe20   :  { %v1300_v13 = vsel %vm1291_vm1, %v1299_v12, %v2785_v8 }
 0xe21   :  { %1308 = vrot.lane.b32.xlu0 %v1300_v13, %s2535_s21 }
 0xe23   :  { %v1293_v14 = vpop.permute.xlu0 %1292  ;;  %v1296_v15 = vpop.permute.xlu1 %1295 }
 0xe24   :  { %v1294_v16 = vsel %vm1291_vm1, %v1293_v14, %v2789_v0  ;;  %v1297_v17 = vsel %vm1291_vm1, %v1296_v15, %v2791_v23 }
 0xe25   :  { %1304 = vrot.lane.b32.xlu0 %v1294_v16, %s2535_s21  ;;  %1306 = vrot.lane.b32.xlu1 %v1297_v17, %s2535_s21 }
 0xe8f   :  { %v1311_v18 = vpop.permute.xlu1 %1310 }
 0xe90   :  { %v1315_v19 = vsel %vm1291_vm1, %v1311_v18, %v2779_v62 }
 0xe91   :  { %1342 = vrot.lane.b32.xlu1 %v1315_v19, %s2526_s1 }
 0xe93   :  { %v1309_v22 = vpop.permute.xlu0 %1308 }
 0xe94   :  { %v1314_v26 = vsel %vm1291_vm1, %v1309_v22, %v2785_v8 }
 0xe95   :  { %1340 = vrot.lane.b32.xlu0 %v1314_v26, %s2526_s1 }
 0xe97   :  { %v1305_v28 = vpop.permute.xlu0 %1304  ;;  %v1307_v37 = vpop.permute.xlu1 %1306 }
 0xe98   :  { %v1312_v30 = vsel %vm1291_vm1, %v1305_v28, %v2789_v0  ;;  %v1313_v31 = vsel %vm1291_vm1, %v1307_v37, %v2791_v23 }
 0xe99   :  { %1336 = vrot.lane.b32.xlu0 %v1312_v30, %s2526_s1  ;;  %1338 = vrot.lane.b32.xlu1 %v1313_v31, %s2526_s1 }
 0xe9d   :  { %1324 = vrot.lane.b32.xlu0 %v1314_v26, %s2536_s22  ;;  %1326 = vrot.lane.b32.xlu1 %v1315_v19, %s2536_s22 }
 0xea1   :  { %1320 = vrot.lane.b32.xlu0 %v1312_v30, %s2536_s22  ;;  %1322 = vrot.lane.b32.xlu1 %v1313_v31, %s2536_s22 }
 0xea5   :  { %1369 = vperm.xlu1 %2468, %v2753_v21   ;;  %1364 = vperm.xlu0 %2469, %v2758_v29  }
 0xea9   :  { %1359 = vperm.xlu1 %2468, %v2763_v32   ;;  %2470 = vset.pattern.permute.xlu0 %v2534_v5 }
 0xead   :  { %1354 = vperm.xlu1 %2468, %v2755_v24  }
 0xeb1   :  { %2471 = vset.pattern.permute.xlu1 %v2534_v5 }
 0xf03   :  { %v1343_v36 = vpop.permute.xlu1 %1342 }
 0xf04   :  { %v1351_v39 = vmul.f32 %v1343_v36, %v2834_v34 }
 0xf06   :  { %2325 = vmatprep.subr.mxu0 %v1351_v39 }
 0xf07   :  { %v1341_v42 = vpop.permute.xlu0 %1340  ;;  %2326 = vmatpush3.msra.mxu0 %v1351_v39 }
 0xf08   :  { %v1350_v43 = vmul.f32 %v1341_v42, %v2834_v34 }
 0xf0a   :  { %2327 = vmatprep.subr.mxu0 %v1350_v43 }
 0xf0b   :  { %v1337_v44 = vpop.permute.xlu0 %1336  ;;  %2328 = vmatpush3.msra.mxu0 %v1350_v43  ;;  %v1339_v45 = vpop.permute.xlu1 %1338  ;;  %v1287_v43 = vld [vmem:[#allocation2 + $0x100] sm:$0xff] }
 0xf0c   :  { %v1349_v46 = vmul.f32 %v1339_v45, %v2834_v34  ;;  %v1348_v47 = vmul.f32 %v1337_v44, %v2834_v34  ;;  %2379 = vmatprep.mubr.msk.f32.mxu1 %vm1372_vm2, %v1287_v43 }
 0xf0e   :  { %2329 = vmatprep.subr.mxu0 %v1349_v46 }
 0xf0f   :  { %2330 = vmatpush3.msra.mxu0 %v1349_v46  ;;  %v1327_v49 = vpop.permute.xlu1 %1326  ;;  %v1325_v51 = vpop.permute.xlu0 %1324 }
 0xf10   :  { %2331 = vmatprep.subr.mxu0 %v1348_v47  ;;  %v1335_v52 = vmul.f32 %v1327_v49, %v2844_v50  ;;  %v1334_v54 = vmul.f32 %v1325_v51, %v2844_v50 }
 0xf11   :  { %2332 = vmatpush3.msra.mxu0 %v1348_v47 }
 0xf12   :  { %2333 = vmatprep.subr.mxu0 %v2779_v62 }
 0xf13   :  { %2334 = vmatpush3.msra.mxu0 %v2779_v62  ;;  %v1323_v53 = vpop.permute.xlu1 %1322  ;;  %v1321_v55 = vpop.permute.xlu0 %1320 }
 0xf14   :  { %2335 = vmatprep.subr.mxu0 %v2785_v8  ;;  %v1333_v56 = vmul.f32 %v1323_v53, %v2844_v50  ;;  %v1332_v57 = vmul.f32 %v1321_v55, %v2844_v50 }
 0xf15   :  { %2336 = vmatpush3.msra.mxu0 %v2785_v8 }
 0xf16   :  { %2337 = vmatprep.subr.mxu0 %v2791_v23 }
 0xf17   :  { %2338 = vmatpush3.msra.mxu0 %v2791_v23 }
 0xf18   :  { %2339 = vmatprep.subr.mxu0 %v2789_v0 }
 0xf19   :  { %2340 = vmatpush3.msra.mxu0 %v2789_v0 }
 0xf1a   :  { %2341 = vmatprep.subr.mxu0 %v1335_v52 }
 0xf1b   :  { %2342 = vmatpush3.msra.mxu0 %v1335_v52 }
 0xf1c   :  { %2343 = vmatprep.subr.mxu0 %v1334_v54 }
 0xf1d   :  { %2344 = vmatpush3.msra.mxu0 %v1334_v54 }
 0xf1e   :  { %2345 = vmatprep.subr.mxu0 %v1333_v56 }
 0xf1f   :  { %2346 = vmatpush3.msra.mxu0 %v1333_v56 }
 0xf20   :  { %2347 = vmatprep.subr.mxu0 %v1332_v57  ;;  %v1370_v61 = vpop.permute.xlu1 %1369  ;;  %v1365_v6 = vpop.permute.xlu0 %1364 }
 0xf21   :  { %2348 = vmatpush3.msra.mxu0 %v1332_v57 }
 0xf22   :  { %2350 = vmatmul.mubr.msk.f32.vlgmr.msra.gmra.mxu0 %vm1372_vm2, %v1284_v58  ;;  %v1288_v58 = vld [vmem:[#allocation2 + $0x108] sm:$0xff] }
 0xf23   :  { %2352 = vmatprep.mubr.msk.f32.mxu0 %vm1372_vm2, %v1285_v59  ;;  %v1289_v59 = vld [vmem:[#allocation2 + $0x110] sm:$0xff] }
 0xf24   :  { %v1360_v1 = vpop.permute.xlu1 %1359 }
 0xf26   :  { %2353 = vmatmul.mubr.msk.f32.gmra.mxu0 %vm1372_vm2, %v1286_v60  ;;  %v1290_v60 = vld [vmem:[#allocation2 + $0x118] sm:$0xff] }
 0xf28   :  { %v1355_v41 = vpop.permute.xlu1 %1354 }
 0xfe2   :  { %v2351_v2 = vpop.f32.mrf.mxu0 }
 0xfe3   :  { %v1457_v10 = vadd.f32 %v2351_v2, %v1360_v1  ;;  %v1753_v1 = vld [vmem:[#allocation2 + $0x1c0] sm:$0xff]  ;;  %v1752_v2 = vld [vmem:[#allocation2 + $0x1b8] sm:$0xff] }
 0xfe4   :  { %v1451_v4 = vpop.f32.mrf.mxu0 }
 0xfe5   :  { %v1452_v3 = vadd.f32 %v1451_v4, %v1355_v41  ;;  %v2864_v13 = vmax.f32 %v1457_v10, 0.0  ;;  %v1751_v4 = vld [vmem:[#allocation2 + $0x1b0] sm:$0xff] }
 0xfe6   :  { %v2354_v38 = vpop.f32.mrf.mxu0 }
 0xfe7   :  { %v1467_v7 = vadd.f32 %v2354_v38, %v1370_v61  ;;  %v2868_v14 = vmax.f32 %v1452_v3, 0.0  ;;  %v2537_v61 = vmov 0.0   ;;  %v1750_v38 = vld [vmem:[#allocation2 + $0x1a8] sm:$0xff] }
 0xfe8   :  { %v1461_v9 = vpop.f32.mrf.mxu0  ;;  %2385 = vmatprep.subr.mxu0 %v2537_v61  ;;  %2393 = vmatprep.mubr.msk.f32.mxu0 %vm2538_vm6, %v2537_v61 }
 0xfe9   :  { %v2858_v11 = vmax.f32 %v1467_v7, 0.0  ;;  %v1462_v40 = vadd.f32 %v1461_v9, %v1365_v6  ;;  %v1749_v6 = vld [vmem:[#allocation2 + $0x1a0] sm:$0xff]  ;;  %v1748_v7 = vld [vmem:[#allocation2 + $0x198] sm:$0xff] }
 0xfeb   :  { %v2860_v12 = vmax.f32 %v1462_v40, 0.0  ;;  %1483 = vrot.lane.b32.xlu0 %v2858_v11, %s2535_s21 }
 0xfed   :  { %1480 = vrot.lane.b32.xlu1 %v2860_v12, %s2535_s21 }
 0xfef   :  { %1477 = vrot.lane.b32.xlu0 %v2864_v13, %s2535_s21 }
 0xff1   :  { %1474 = vrot.lane.b32.xlu1 %v2868_v14, %s2535_s21 }
0x105d   :  { %v1484_v15 = vpop.permute.xlu0 %1483 }
0x105e   :  { %v1485_v16 = vsel %vm1291_vm1, %v1484_v15, %v2858_v11 }
0x105f   :  { %1492 = vrot.lane.b32.xlu0 %v1485_v16, %s2535_s21  ;;  %v1481_v17 = vpop.permute.xlu1 %1480 }
0x1060   :  { %v1482_v18 = vsel %vm1291_vm1, %v1481_v17, %v2860_v12 }
0x1061   :  { %v1478_v19 = vpop.permute.xlu0 %1477  ;;  %1490 = vrot.lane.b32.xlu1 %v1482_v18, %s2535_s21 }
0x1062   :  { %v1479_v22 = vsel %vm1291_vm1, %v1478_v19, %v2864_v13 }
0x1063   :  { %1488 = vrot.lane.b32.xlu0 %v1479_v22, %s2535_s21  ;;  %v1475_v26 = vpop.permute.xlu1 %1474 }
0x1064   :  { %v1476_v28 = vsel %vm1291_vm1, %v1475_v26, %v2868_v14 }
0x1065   :  { %1486 = vrot.lane.b32.xlu1 %v1476_v28, %s2535_s21 }
0x10d1   :  { %v1493_v37 = vpop.permute.xlu0 %1492 }
0x10d2   :  { %v1497_v30 = vsel %vm1291_vm1, %v1493_v37, %v2858_v11 }
0x10d3   :  { %1524 = vrot.lane.b32.xlu0 %v1497_v30, %s2526_s1  ;;  %v1491_v31 = vpop.permute.xlu1 %1490 }
0x10d4   :  { %v1496_v20 = vsel %vm1291_vm1, %v1491_v31, %v2860_v12 }
0x10d5   :  { %v1489_v33 = vpop.permute.xlu0 %1488  ;;  %1522 = vrot.lane.b32.xlu1 %v1496_v20, %s2526_s1 }
0x10d6   :  { %v1495_v36 = vsel %vm1291_vm1, %v1489_v33, %v2864_v13  ;;  %v1762_v33 = vld [vmem:[#allocation2 + $0x208] sm:$0xff] }
0x10d7   :  { %1520 = vrot.lane.b32.xlu0 %v1495_v36, %s2526_s1  ;;  %v1487_v39 = vpop.permute.xlu1 %1486 }
0x10d8   :  { %v1494_v42 = vsel %vm1291_vm1, %v1487_v39, %v2868_v14  ;;  %v1760_v39 = vld [vmem:[#allocation2 + $0x1f8] sm:$0xff] }
0x10d9   :  { %1518 = vrot.lane.b32.xlu1 %v1494_v42, %s2526_s1 }
0x10db   :  { %1508 = vrot.lane.b32.xlu0 %v1497_v30, %s2536_s22 }
0x10dd   :  { %1506 = vrot.lane.b32.xlu1 %v1496_v20, %s2536_s22  ;;  %v1655_v20 = vld [vmem:[#allocation2 + $0x180] sm:$0x7] }
0x10df   :  { %1504 = vrot.lane.b32.xlu0 %v1495_v36, %s2536_s22  ;;  %v1761_v36 = vld [vmem:[#allocation2 + $0x200] sm:$0xff] }
0x10e1   :  { %1502 = vrot.lane.b32.xlu1 %v1494_v42, %s2536_s22  ;;  %v1759_v42 = vld [vmem:[#allocation2 + $0x1f0] sm:$0xff] }
0x10e3   :  { %1547 = vperm.xlu0 %2470, %v2753_v21  }
0x10e5   :  { %1543 = vperm.xlu1 %2471, %v2758_v29  }
0x10e7   :  { %1535 = vperm.xlu0 %2470, %v2755_v24  }
0x10e9   :  { %1539 = vperm.xlu1 %2471, %v2763_v32  }
0x10eb   :  { %2473 = vset.pattern.permute.xlu0 %v2529_v63 }
0x10ed   :  { %2472 = vset.pattern.permute.xlu1 %v2528_v48 }
0x1145   :  { %v1525_v44 = vpop.permute.xlu0 %1524 }
0x1146   :  { %v1533_v45 = vmul.f32 %v1525_v44, %v2834_v34 }
0x1147   :  { %v1523_v46 = vpop.permute.xlu1 %1522 }
0x1148   :  { %v1532_v47 = vmul.f32 %v1523_v46, %v2834_v34  ;;  %2355 = vmatprep.subr.mxu1 %v1533_v45 }
0x1149   :  { %2356 = vmatpush3.msra.mxu1 %v1533_v45  ;;  %v1521_v49 = vpop.permute.xlu0 %1520 }
0x114a   :  { %v1531_v21 = vmul.f32 %v1521_v49, %v2834_v34  ;;  %2357 = vmatprep.subr.mxu1 %v1532_v47  ;;  %v1757_v49 = vld [vmem:[#allocation2 + $0x1e0] sm:$0xff] }
0x114b   :  { %2358 = vmatpush3.msra.mxu1 %v1532_v47  ;;  %v1519_v24 = vpop.permute.xlu1 %1518  ;;  %v1758_v47 = vld [vmem:[#allocation2 + $0x1e8] sm:$0xff] }
0x114c   :  { %v1530_v29 = vmul.f32 %v1519_v24, %v2834_v34  ;;  %2359 = vmatprep.subr.mxu1 %v1531_v21  ;;  %v1755_v24 = vld [vmem:[#allocation2 + $0x1d0] sm:$0xff] }
0x114d   :  { %2360 = vmatpush3.msra.mxu1 %v1531_v21  ;;  %v1509_v32 = vpop.permute.xlu0 %1508  ;;  %v1756_v21 = vld [vmem:[#allocation2 + $0x1d8] sm:$0xff] }
0x114e   :  { %2361 = vmatprep.subr.mxu1 %v1530_v29  ;;  %v1517_v52 = vmul.f32 %v1509_v32, %v2844_v50 }
0x114f   :  { %2362 = vmatpush3.msra.mxu1 %v1530_v29  ;;  %v1507_v51 = vpop.permute.xlu1 %1506 }
0x1150   :  { %2363 = vmatprep.subr.mxu1 %v2858_v11  ;;  %v1516_v54 = vmul.f32 %v1507_v51, %v2844_v50 }
0x1151   :  { %2364 = vmatpush3.msra.mxu1 %v2858_v11  ;;  %v1505_v53 = vpop.permute.xlu0 %1504 }
0x1152   :  { %2365 = vmatprep.subr.mxu1 %v2860_v12  ;;  %v1515_v56 = vmul.f32 %v1505_v53, %v2844_v50 }
0x1153   :  { %2366 = vmatpush3.msra.mxu1 %v2860_v12  ;;  %v1503_v55 = vpop.permute.xlu1 %1502 }
0x1154   :  { %2367 = vmatprep.subr.mxu1 %v2864_v13  ;;  %v1514_v57 = vmul.f32 %v1503_v55, %v2844_v50  ;;  %v1754_v50 = vld [vmem:[#allocation2 + $0x1c8] sm:$0xff] }
0x1155   :  { %2368 = vmatpush3.msra.mxu1 %v2864_v13 }
0x1156   :  { %2369 = vmatprep.subr.mxu1 %v2868_v14 }
0x1157   :  { %2370 = vmatpush3.msra.mxu1 %v2868_v14 }
0x1158   :  { %2371 = vmatprep.subr.mxu1 %v1517_v52 }
0x1159   :  { %2372 = vmatpush3.msra.mxu1 %v1517_v52 }
0x115a   :  { %2373 = vmatprep.subr.mxu1 %v1516_v54 }
0x115b   :  { %2374 = vmatpush3.msra.mxu1 %v1516_v54 }
0x115c   :  { %2375 = vmatprep.subr.mxu1 %v1515_v56 }
0x115d   :  { %2376 = vmatpush3.msra.mxu1 %v1515_v56 }
0x115e   :  { %2377 = vmatprep.subr.mxu1 %v1514_v57  ;;  %v1548_v9 = vpop.permute.xlu0 %1547 }
0x115f   :  { %2378 = vmatpush3.msra.mxu1 %v1514_v57 }
0x1160   :  { %2380 = vmatmul.mubr.msk.f32.vlgmr.msra.gmra.mxu1 %vm1372_vm2, %v1288_v58  ;;  %2415 = vmatprep.subr.mxu1 %v2537_v61  ;;  %v1544_v41 = vpop.permute.xlu1 %1543 }
0x1161   :  { %2382 = vmatprep.mubr.msk.f32.mxu1 %vm1372_vm2, %v1289_v59  ;;  %2416 = vmatpush3.msra.mxu1 %v1754_v50 }
0x1162   :  { %2417 = vmatprep.subr.mxu1 %v2537_v61  ;;  %v1536_v3 = vpop.permute.xlu0 %1535 }
0x1163   :  { %2418 = vmatpush3.msra.mxu1 %v1753_v1 }
0x1164   :  { %2383 = vmatmul.mubr.msk.f32.gmra.mxu1 %vm1372_vm2, %v1290_v60  ;;  %2419 = vmatprep.subr.mxu1 %v2537_v61  ;;  %v1540_v11 = vpop.permute.xlu1 %1539 }
0x1165   :  { %2431 = vmatprep.mubr.msk.f32.mxu1 %vm2538_vm6, %v2537_v61  ;;  %2420 = vmatpush3.msra.mxu1 %v1752_v2 }
0x1166   :  { %2421 = vmatprep.subr.mxu1 %v2537_v61 }
0x1167   :  { %2422 = vmatpush3.msra.mxu1 %v1751_v4 }
0x1168   :  { %2423 = vmatprep.subr.mxu1 %v2537_v61 }
0x1169   :  { %2424 = vmatpush3.msra.mxu1 %v1750_v38 }
0x116a   :  { %2425 = vmatprep.subr.mxu1 %v2537_v61 }
0x116b   :  { %2426 = vmatpush3.msra.mxu1 %v1749_v6 }
0x116c   :  { %2427 = vmatprep.subr.mxu1 %v2537_v61 }
0x116d   :  { %2428 = vmatpush3.msra.mxu1 %v1748_v7  ;;  %v1909_v7 = vld [vmem:[#allocation2 + $0x188] sm:$0x1] }
0x116e   :  { %2429 = vmatprep.subr.mxu1 %v2537_v61 }
0x1220   :  { %v2381_v10 = vpop.f32.mrf.mxu1 }
0x1221   :  { %v1634_v13 = vadd.f32 %v2381_v10, %v1540_v11 }
0x1222   :  { %v1628_v40 = vpop.f32.mrf.mxu1 }
0x1223   :  { %v1629_v16 = vadd.f32 %v1628_v40, %v1536_v3  ;;  %v1648_v19 = vadd.f32 %v1634_v13, %v2791_v23  ;;  %v2539_v3 = vmov 4   ;;  %v2541_v13 = vmov 5  }
0x1224   :  { %v2384_v12 = vpop.f32.mrf.mxu1 }
0x1225   :  { %v1644_v14 = vadd.f32 %v2384_v12, %v1548_v9  ;;  %v1647_v28 = vadd.f32 %v1629_v16, %v2789_v0  ;;  %v1652_v30 = vmax.f32 %v1648_v19, 0.0  ;;  %v2540_v12 = vmov 6  }
0x1226   :  { %v1638_v15 = vpop.f32.mrf.mxu1 }
0x1227   :  { %v1650_v17 = vadd.f32 %v1644_v14, %v2779_v62  ;;  %v1639_v18 = vadd.f32 %v1638_v15, %v1544_v41  ;;  %v1651_v31 = vmax.f32 %v1647_v28, 0.0  ;;  %v1747_v62 = vld [vmem:[#allocation2 + $0x190] sm:$0xff] }
0x1228   :  { %2430 = vmatpush3.msra.mxu1 %v1747_v62  ;;  %v2028_v28 = vld [vmem:[#allocation2 + $0x210] sm:$0x1] }
0x1229   :  { %v1654_v22 = vmax.f32 %v1650_v17, 0.0  ;;  %v1649_v26 = vadd.f32 %v1639_v18, %v2785_v8  ;;  %v2542_v17 = vmov 8  }
0x122b   :  { %v1653_v37 = vmax.f32 %v1649_v26, 0.0  ;;  %2386 = vmatpush3.msra.mxu0 %v1654_v22  ;;  %v2543_v26 = vmov 9  }
0x122c   :  { %2387 = vmatprep.subr.mxu0 %v2537_v61 }
0x122d   :  { %2388 = vmatpush3.msra.mxu0 %v1653_v37  ;;  %v2544_v37 = vmov 7  }
0x122e   :  { %2389 = vmatprep.subr.mxu0 %v2537_v61 }
0x122f   :  { %2390 = vmatpush3.msra.mxu0 %v1652_v30 }
0x1230   :  { %2391 = vmatprep.subr.mxu0 %v2537_v61 }
0x1231   :  { %2392 = vmatpush3.msra.mxu0 %v1651_v31  ;;  %v1950_v31 = vand.u32 63, %v2572_v25 }
0x1232   :  { %2394 = vmatmul.mubr.msk.f32.vlgmr.msra.gmra.mxu0 %vm360_vm5, %v1655_v20  ;;  %2396 = vmatprep.subr.mxu0 %v2537_v61  ;;  %vm1910_vm5 = vcmask 1040384  }
0x1233   :  { %2412 = vmatprep.mubr.msk.f32.mxu0 %vm2538_vm6, %v2537_v61  ;;  %2397 = vmatpush3.msra.mxu0 %v1762_v33  ;;  %vm1958_vm8 = vcmp.eq.s32.totalorder %v1950_v31, 0  ;;  %vm1960_vm9 = vcmp.eq.s32.totalorder %v1950_v31, 63 }
0x1234   :  { %2398 = vmatprep.subr.mxu0 %v2537_v61  ;;  %v1959_v62 = vsel %vm1958_vm8, 0.0, %v2527_v27 }
0x1235   :  { %2399 = vmatpush3.msra.mxu0 %v1761_v36 }
0x1236   :  { %2400 = vmatprep.subr.mxu0 %v2537_v61 }
0x1237   :  { %2401 = vmatpush3.msra.mxu0 %v1760_v39 }
0x1238   :  { %2402 = vmatprep.subr.mxu0 %v2537_v61 }
0x1239   :  { %2403 = vmatpush3.msra.mxu0 %v1759_v42 }
0x123a   :  { %2404 = vmatprep.subr.mxu0 %v2537_v61 }
0x123b   :  { %2405 = vmatpush3.msra.mxu0 %v1758_v47 }
0x123c   :  { %2406 = vmatprep.subr.mxu0 %v2537_v61 }
0x123d   :  { %2407 = vmatpush3.msra.mxu0 %v1757_v49 }
0x123e   :  { %2408 = vmatprep.subr.mxu0 %v2537_v61 }
0x123f   :  { %2409 = vmatpush3.msra.mxu0 %v1756_v21 }
0x1240   :  { %2410 = vmatprep.subr.mxu0 %v2537_v61 }
0x1241   :  { %2411 = vmatpush3.msra.mxu0 %v1755_v24 }
0x12f2   :  { %v1725_v8 = vpop.f32.mrf.mxu0 }
0x12f3   :  { %v1730_v0 = vrot.slane %v1725_v8, 2  ;;  %2432 = vmatmul.mubr.msk.f32.vlgmr.msra.gmra.mxu1 %vm1126_vm12, %v1725_v8 }
0x12f4   :  { %v2395_v23 = vpop.f32.mrf.mxu0 }
0x12f5   :  { %1732 = vrot.lane.b32.xlu1 %v1730_v0, %s2535_s21 }
0x1367   :  { %v1733_v43 = vpop.permute.xlu1 %1732 }
0x1368   :  { %v1734_v44 = vsel %vm1291_vm1, %v1733_v43, %v1730_v0 }
0x1369   :  { %1735 = vrot.lane.b32.xlu0 %v1734_v44, %s2535_s21 }
0x13b3   :  { %v1905_v45 = vpop.f32.mrf.mxu1 }
0x13b5   :  { %v2433_v46 = vpop.f32.mrf.mxu1 }
0x13db   :  { %v1736_v29 = vpop.permute.xlu0 %1735 }
0x13dc   :  { %v1737_v32 = vsel %vm1291_vm1, %v1736_v29, %v1730_v0  ;;  %v1961_v0 = vsel %vm1960_vm9, 0.0, %v2527_v27 }
0x13dd   :  { %1739 = vrot.lane.b32.xlu1 %v1737_v32, %s2526_s1 }
0x144f   :  { %v1740_v51 = vpop.permute.xlu1 %1739 }
0x1450   :  { %v1742_v52 = vmul.f32 %v1740_v51, %v2834_v34 }
0x1452   :  { %v1744_v53 = vrot.slane %v1742_v52, 7 }
0x1454   :  { %v1746_v54 = vadd.f32 %v1744_v53, %v1725_v8 }
0x1456   :  { %v1764_v55 = vrot.slane %v1746_v54, 1 }
0x1458   :  { %2413 = vmatmul.mubr.msk.f32.vlgmr.msra.gmra.mxu0 %vm1126_vm12, %v1764_v55 }
0x1518   :  { %v1833_v56 = vpop.f32.mrf.mxu0 }
0x1519   :  { %v1906_v57 = vadd.f32 %v1905_v45, %v1833_v56 }
0x151a   :  { %v2414_v58 = vpop.f32.mrf.mxu0 }
0x151b   :  { %v1911_v59 = vsel %vm1910_vm5, %v1906_v57, 0.0  ;;  %v1915_v60 = vmul.f32 %v1906_v57, %v1906_v57 }
0x151c   :  { %1912 = vadd.xlane.f32.xlu0 %v1911_v59 }
0x151d   :  { %v1916_v61 = vsel %vm1910_vm5, %v1915_v60, 0.0 }
0x151e   :  { %1917 = vadd.xlane.f32.xlu1 %v1916_v61 }
0x15a5   :  { %v1913_v50 = vpop.xlane.xlu0 %1912 }
0x15a6   :  { %v1914_v1 = vmul.f32 0.0078125, %v1913_v50 }
0x15a7   :  { %v1918_v2 = vpop.xlane.xlu1 %1917 }
0x15a8   :  { %v1920_v4 = vmul.f32 %v1914_v1, %v1914_v1  ;;  %v1919_v38 = vmul.f32 0.0078125, %v1918_v2 }
0x15aa   :  { %v1921_v34 = vsub.f32 %v1919_v38, %v1920_v4 }
0x15ac   :  { %v1922_v6 = vadd.f32 1e-05, %v1921_v34 }
0x15ae   :  { %2498 = vrsqrt.f32 %v1922_v6 }
0x15bb   :  { %v2499_v41 = vpop.eup %2498 }
0x15bc   :  { %v1924_v9 = vmul.f32 %v2499_v41, %v1909_v7 }
0x15be   :  { %1933 = vperm.xlu1 %2472, %v1924_v9   ;;  %v1925_v10 = vmul.f32 %v1924_v9, %v1914_v1 }
0x15c0   :  { %1927 = vrot.lane.b32.xlu0 %v1925_v10, %s2530_s18 }
0x15c2   :  { %2474 = vset.pattern.permute.xlu1 %v2533_v35 }
0x15c3   :  { %1970 = vperm.xlu1 %2474, %v1909_v7  }
0x15c7   :  { %2475 = vset.pattern.permute.xlu1 %v2534_v5 }
0x15c8   :  { %1975 = vperm.xlu1 %2475, %v1909_v7  }
0x15cc   :  { %2478 = vset.pattern.permute.xlu1 %v2540_v12 }
0x1632   :  { %v1928_v11 = vpop.permute.xlu0 %1927 }
0x1633   :  { %v1930_v40 = vsub.f32 %v1909_v7, %v1928_v11 }
0x1635   :  { %1939 = vperm.xlu0 %2473, %v1930_v40  }
0x1639   :  { %2476 = vset.pattern.permute.xlu0 %v2539_v3  ;;  %v1934_v14 = vpop.permute.xlu1 %1933 }
0x163a   :  { %1981 = vperm.xlu0 %2476, %v1909_v7   ;;  %v1936_v15 = vmul.f32 %v1934_v14, %v1906_v57 }
0x163e   :  { %2477 = vset.pattern.permute.xlu0 %v2541_v13  ;;  %v1971_v30 = vpop.permute.xlu1 %1970 }
0x163f   :  { %1987 = vperm.xlu0 %2477, %v1909_v7  }
0x1643   :  { %2480 = vset.pattern.permute.xlu0 %v2542_v17  ;;  %v1976_v20 = vpop.permute.xlu1 %1975 }
0x1644   :  { %2010 = vperm.xlu0 %2480, %v1909_v7  }
0x1648   :  { %2481 = vset.pattern.permute.xlu0 %v2543_v26 }
0x1649   :  { %2016 = vperm.xlu0 %2481, %v1909_v7  }
0x164d   :  { %2484 = vset.pattern.permute.xlu0 %v2533_v35 }
0x164e   :  { %2042 = vperm.xlu0 %2484, %v2028_v28  }
0x1652   :  { %2485 = vset.pattern.permute.xlu0 %v2534_v5 }
0x1653   :  { %2048 = vperm.xlu0 %2485, %v2028_v28  }
0x16b0   :  { %v1940_v16 = vpop.permute.xlu0 %1939 }
0x16b1   :  { %v1942_v18 = vadd.f32 %v1940_v16, %v1936_v15 }
0x16b3   :  { %vm1943_vm7 = vcmp.gt.f32.partialorder %v1942_v18, 0.0  ;;  %v1944_v19 = vmul.f32 0.01, %v1942_v18 }
0x16b5   :  { %v1945_v22 = vsel %vm1943_vm7, %v1942_v18, %v1944_v19  ;;  %v1982_v23 = vpop.permute.xlu0 %1981 }
0x16b6   :  { %1962 = vrot.lane.b32.xlu1 %v1945_v22, %s2530_s18  ;;  %v1978_v39 = vmul.f32 %v1976_v20, %v1945_v22 }
0x16ba   :  { %1965 = vrot.lane.b32.xlu1 %v1945_v22, %s2526_s1 }
0x16be   :  { %1999 = vperm.xlu1 %2478, %v1909_v7  }
0x16c2   :  { %2479 = vset.pattern.permute.xlu1 %v2544_v37 }
0x16c3   :  { %2004 = vperm.xlu1 %2479, %v1909_v7  }
0x16c7   :  { %2482 = vset.pattern.permute.xlu1 %v2528_v48  ;;  %v1988_v48 = vpop.permute.xlu0 %1987 }
0x16cb   :  { %v2011_v21 = vpop.permute.xlu0 %2010 }
0x16cf   :  { %v2017_v54 = vpop.permute.xlu0 %2016 }
0x16d3   :  { %v2043_v50 = vpop.permute.xlu0 %2042 }
0x16d7   :  { %v2049_v7 = vpop.permute.xlu0 %2048 }
0x1728   :  { %v1963_v35 = vpop.permute.xlu1 %1962 }
0x1729   :  { %v1964_v8 = vmul.f32 %v1963_v35, %v1959_v62 }
0x172b   :  { %v1973_v33 = vmul.f32 %v1971_v30, %v1964_v8 }
0x172c   :  { %v1966_v36 = vpop.permute.xlu1 %1965 }
0x172d   :  { %v1967_v5 = vmul.f32 %v1966_v36, %v1961_v0  ;;  %v1979_v43 = vadd.f32 %v1978_v39, %v1973_v33 }
0x172f   :  { %v1984_v42 = vmul.f32 %v1982_v23, %v1967_v5 }
0x1731   :  { %v1985_v44 = vadd.f32 %v1984_v42, %v1979_v43 }
0x1733   :  { %v1990_v45 = vadd.f32 %v1988_v48, %v1985_v44 }
0x1735   :  { %v1991_v25 = vmax.f32 %v1990_v45, 0.0 }
0x1737   :  { %1992 = vrot.lane.b32.xlu1 %v1991_v25, %s2530_s18 }
0x1739   :  { %v2000_v27 = vpop.permute.xlu1 %1999 }
0x173b   :  { %1995 = vrot.lane.b32.xlu1 %v1991_v25, %s2526_s1 }
0x173e   :  { %v2005_v46 = vpop.permute.xlu1 %2004 }
0x173f   :  { %2031 = vperm.xlu1 %2482, %v2028_v28   ;;  %v2007_v32 = vmul.f32 %v2005_v46, %v1991_v25 }
0x1743   :  { %2483 = vset.pattern.permute.xlu1 %v2529_v63 }
0x1744   :  { %2036 = vperm.xlu1 %2483, %v2028_v28  }
0x17a9   :  { %v1993_v47 = vpop.permute.xlu1 %1992 }
0x17aa   :  { %v1994_v49 = vmul.f32 %v1993_v47, %v1959_v62 }
0x17ac   :  { %v2002_v24 = vmul.f32 %v2000_v27, %v1994_v49 }
0x17ad   :  { %v1996_v29 = vpop.permute.xlu1 %1995 }
0x17ae   :  { %v1997_v51 = vmul.f32 %v1996_v29, %v1961_v0  ;;  %v2008_v53 = vadd.f32 %v2007_v32, %v2002_v24 }
0x17b0   :  { %v2013_v52 = vmul.f32 %v2011_v21, %v1997_v51 }
0x17b2   :  { %v2014_v55 = vadd.f32 %v2013_v52, %v2008_v53 }
0x17b4   :  { %v2019_v56 = vadd.f32 %v2017_v54, %v2014_v55 }
0x17b6   :  { %v2020_v57 = vadd.f32 %v2019_v56, %v1945_v22 }
0x17b8   :  { %v2021_v58 = vmax.f32 %v2020_v57, 0.0 }
0x17ba   :  { %2022 = vrot.lane.b32.xlu1 %v2021_v58, %s2530_s18  ;;  %v2032_v63 = vpop.permute.xlu1 %2031 }
0x17be   :  { %2025 = vrot.lane.b32.xlu1 %v2021_v58, %s2526_s1 }
0x17bf   :  { %v2037_v59 = vpop.permute.xlu1 %2036 }
0x17c0   :  { %v2039_v4 = vmul.f32 %v2037_v59, %v2021_v58 }
0x182c   :  { %v2023_v60 = vpop.permute.xlu1 %2022 }
0x182d   :  { %v2024_v61 = vmul.f32 %v2023_v60, %v1959_v62 }
0x182f   :  { %v2034_v1 = vmul.f32 %v2032_v63, %v2024_v61 }
0x1830   :  { %v2026_v2 = vpop.permute.xlu1 %2025 }
0x1831   :  { %v2027_v38 = vmul.f32 %v2026_v2, %v1961_v0  ;;  %v2040_v6 = vadd.f32 %v2039_v4, %v2034_v1 }
0x1833   :  { %v2045_v34 = vmul.f32 %v2043_v50, %v2027_v38 }
0x1835   :  { %v2046_v41 = vadd.f32 %v2045_v34, %v2040_v6 }
0x1837   :  { %v2051_v9 = vadd.f32 %v2049_v7, %v2046_v41 }
0x1839   :  { %2052 = vst [vmem:[%s2988_s2] sm:$0x1] %v2051_v9 }
0x183a   :  { %2057 = vsyncpa [#allocation3], 1 }

</bundles_post_ra>
